<compile_context>
chip_gen: v7x
topology: tpu7x:2x2x1
jax: 0.10.0
libtpu: 0.0.40
codegen_flags: <defaults>
</compile_context>

<pallas_src>
import functools
import numpy as np

import jax
import jax.numpy as jnp
from jax.experimental import pallas as pl
from jax.experimental.pallas import tpu as pltpu

VMEM_SPEC = pl.BlockSpec(memory_space=pltpu.MemorySpace.VMEM)

LEAKY_SLOPE = 0.01   # nn.LeakyReLU default
GAT_SLOPE = 0.2      # GATConv negative_slope
LN_EPS = 1e-5


# ----------------------------------------------------------------------------
# Shared forward math (jnp only).  Traced to Mosaic inside the Pallas kernel and
# to XLA for the pure-JAX reference, so both paths are guaranteed to agree.
# ----------------------------------------------------------------------------
def _leaky(x, slope):
    return jnp.where(x >= 0, x, slope * x)


def _causal_conv(h, w_flat, b, K, dil):
    """Causal dilated conv1d as one im2col GEMM.  h: (B, T, Cin) -> (B, T, Cout)."""
    B, T, Cin = h.shape
    Cout = w_flat.shape[1]
    pad = (K - 1) * dil
    zrows = ((pad + 7) // 8) * 8                      # sublane-tile aligned zero block
    hp = jnp.concatenate(
        [jnp.zeros((B, zrows, Cin), jnp.float32), h], axis=1)      # (B, zrows+T, Cin)
    off = zrows - pad
    taps = [hp[:, off + k * dil: off + k * dil + T, :] for k in range(K)]
    xcol = jnp.concatenate(taps, axis=-1).reshape(B * T, K * Cin)  # (B*T, K*Cin)
    y = jnp.dot(xcol, w_flat, preferred_element_type=jnp.float32) + b
    return y.reshape(B, T, Cout)


def _gat(z, cnt, w_src, att_src, att_dst, bias, w_lin, H):
    """torch_geometric-style GATConv (concat heads + bias) followed by GATModel.lin."""
    N, D = z.shape
    C = D                                               # out channels per head
    xh_all = jnp.dot(z, w_src, preferred_element_type=jnp.float32)     # (N, H*C)
    present = cnt > 0
    out = jnp.zeros((N, w_lin.shape[1]), jnp.float32)
    for h in range(H):
        xh = xh_all[:, h * C:(h + 1) * C]                               # (N, C)
        a_src = jnp.sum(xh * att_src[h:h + 1, :], axis=1, keepdims=True)  # (N, 1)
        a_dst = jnp.sum(xh * att_dst[h:h + 1, :], axis=1, keepdims=True)  # (N, 1)
        logits = _leaky(a_dst + jnp.transpose(a_src), GAT_SLOPE)        # (tgt, src)
        masked = jnp.where(present, logits, -1e30)
        m = jnp.max(masked, axis=1, keepdims=True)
        e = cnt * jnp.exp(masked - m)        # duplicate edges weighted by multiplicity
        alpha = e / jnp.sum(e, axis=1, keepdims=True)
        head = (jnp.dot(alpha, xh, preferred_element_type=jnp.float32)
                + bias[:, h * C:(h + 1) * C])
        # (concat_h head_h) @ w_lin  ==  sum_h head_h @ w_lin[h*C:(h+1)*C]
        out = out + jnp.dot(head, w_lin[h * C:(h + 1) * C, :],
                            preferred_element_type=jnp.float32)
    return out


def _hsc_math(P, *, K, H, tcn_has_down):
    """Full HSC forward on a dict of jnp arrays.  Returns flat (N, D) rep and dec."""
    x = P["x"]                                        # (B, T, Din)
    B, T, _ = x.shape
    cnt = P["cnt"]                                    # (N, N)

    # ---------- Hypersphere encoder: TCN + l1/l2 ----------
    h = x
    for i, has_down in enumerate(tcn_has_down):
        dil = 2 ** i
        y1 = jnp.maximum(_causal_conv(h, P[f"t{i}_w1"], P[f"t{i}_b1"], K, dil), 0.0)
        if has_down:
            Cin = h.shape[-1]
            res = (jnp.dot(h.reshape(B * T, Cin), P[f"t{i}_dw"],
                           preferred_element_type=jnp.float32)
                   + P[f"t{i}_db"]).reshape(B, T, -1)
        else:
            res = h
        y2 = jnp.maximum(_causal_conv(y1, P[f"t{i}_w2"], P[f"t{i}_b2"], K, dil), 0.0)
        h = jnp.maximum(y2 + res, 0.0)

    D = h.shape[-1]
    hf = h.reshape(B * T, D)
    hf = _leaky(jnp.dot(hf, P["l1_w"], preferred_element_type=jnp.float32)
                + P["l1_b"], LEAKY_SLOPE)
    rep = jnp.dot(hf, P["l2_w"], preferred_element_type=jnp.float32) + P["l2_b"]

    # ---------- GAT decoder ----------
    z = rep - P["c"]                                   # (N, D)
    out = _gat(z, cnt, P["g1_w_src"], P["g1_att_src"], P["g1_att_dst"],
               P["g1_bias"], P["g1_w_lin"], H)
    out = _leaky(jnp.dot(out, P["lin1_w"], preferred_element_type=jnp.float32)
                 + P["lin1_b"], LEAKY_SLOPE)
    mean = jnp.mean(out, axis=-1, keepdims=True)
    xc = out - mean
    var = jnp.mean(xc * xc, axis=-1, keepdims=True)
    out = xc * jax.lax.rsqrt(var + LN_EPS) * P["ln_g"] + P["ln_b"]
    # dropout: identity (eval mode)
    out = _gat(out, cnt, P["g2_w_src"], P["g2_att_src"], P["g2_att_dst"],
               P["g2_bias"], P["g2_w_lin"], H)
    out = _leaky(jnp.dot(out, P["lin2_w"], preferred_element_type=jnp.float32)
                 + P["lin2_b"], LEAKY_SLOPE)
    return rep, out


# ----------------------------------------------------------------------------
# Fused Pallas kernel: everything VMEM-resident, only rep/dec written to HBM.
# ----------------------------------------------------------------------------
def _hsc_kernel(*refs, names, K, H, tcn_has_down):
    n_in = len(names)
    P = {name: refs[i][...].astype(jnp.float32) for i, name in enumerate(names)}
    rep_ref, dec_ref = refs[n_in], refs[n_in + 1]
    rep, dec = _hsc_math(P, K=K, H=H, tcn_has_down=tcn_has_down)
    B, T, _ = P["x"].shape
    D = rep.shape[-1]
    rep_ref[...] = rep.reshape(B, T, D).astype(rep_ref.dtype)
    dec_ref[...] = dec.reshape(B, T, D).astype(dec_ref.dtype)


def _flatten_inputs(x, c, params, cnt):
    names, args = [], []

    def add(n, a):
        names.append(n)
        args.append(a)

    add("x", x)
    add("c", c.reshape(1, -1))
    add("cnt", cnt)
    tcn_has_down = []
    for i, layer in enumerate(params["hyp"]["tcn"]):
        add(f"t{i}_w1", layer["w1"]); add(f"t{i}_b1", layer["b1"])
        add(f"t{i}_w2", layer["w2"]); add(f"t{i}_b2", layer["b2"])
        has_down = "down_w" in layer
        if has_down:
            add(f"t{i}_dw", layer["down_w"]); add(f"t{i}_db", layer["down_b"])
        tcn_has_down.append(has_down)
    hyp = params["hyp"]
    for n in ("l1_w", "l1_b", "l2_w", "l2_b"):
        add(n, hyp[n])
    dec = params["dec"]
    for pre, g in (("g1_", dec["gat1"]), ("g2_", dec["gat2"])):
        add(pre + "w_src", g["w_src"]); add(pre + "att_src", g["att_src"])
        add(pre + "att_dst", g["att_dst"]); add(pre + "bias", g["bias"])
        add(pre + "w_lin", g["w_lin"])
    for n in ("lin1_w", "lin1_b", "ln_g", "ln_b", "lin2_w", "lin2_b"):
        add(n, dec[n])
    return tuple(names), args, tuple(tcn_has_down)


def hsc_forward(x, c, params, cnt, kernel_size, num_heads):
    """rep, dec = HSC(x, c) as one fused Pallas call."""
    B, T, _ = x.shape
    names, args, tcn_has_down = _flatten_inputs(x, c, params, cnt)
    D = params["hyp"]["l2_w"].shape[1]
    kern = functools.partial(_hsc_kernel, names=names, K=kernel_size,
                             H=num_heads, tcn_has_down=tcn_has_down)
    out_sds = jax.ShapeDtypeStruct((B, T, D), x.dtype)
    # TODO(synk): at realistic N (= batch * window_size) add a grid over target-row
    # blocks with a flash-style online softmax and dimension_semantics=("parallel",...)
    # so both v7x TensorCores are used and the (N,N) attention fits the 64 MiB VMEM;
    # at N=24 a single grid-less VMEM-resident call is optimal.
    rep, dec_out = pl.pallas_call(
        kern,
        out_shape=(out_sds, out_sds),
        in_specs=[VMEM_SPEC] * len(args),
        out_specs=(VMEM_SPEC, VMEM_SPEC),
    )(*args)
    return rep, dec_out


def hsc_reference(x, c, params, cnt, kernel_size, num_heads):
    """Pure-JAX (XLA) reference built from the exact same math."""
    names, args, tcn_has_down = _flatten_inputs(x, c, params, cnt)
    P = {n: a.astype(jnp.float32) for n, a in zip(names, args)}
    rep, dec = _hsc_math(P, K=kernel_size, H=num_heads, tcn_has_down=tcn_has_down)
    B, T, _ = x.shape
    return rep.reshape(B, T, -1), dec.reshape(B, T, -1)


# ----------------------------------------------------------------------------
# Graph construction (reproduces GATModel's edge_index + PyG self-loop handling)
# ----------------------------------------------------------------------------
def build_edge_counts(batch_size, window_size):
    W, B = window_size, batch_size
    edges = np.array([[i, j] for i in range(W) for j in range(W) if i != j],
                     dtype=np.int64).T                    # (2, E)
    rep = np.tile(edges, (B, 1))                          # .repeat(B, 1)
    ei = rep.reshape(2, -1)                               # .view(2, -1)
    src, dst = ei[0], ei[1]
    keep = src != dst                                     # remove_self_loops
    src, dst = src[keep], dst[keep]
    N = B * W
    cnt = np.zeros((N, N), dtype=np.float32)
    np.add.at(cnt, (dst, src), 1.0)                       # multiplicity j -> i
    cnt[np.arange(N), np.arange(N)] += 1.0                # add_self_loops
    return jnp.asarray(cnt)


# ----------------------------------------------------------------------------
# Deterministic parameter construction (conv weights pre-flattened for im2col,
# biases stored in broadcast-ready (1, C) shapes).
# ----------------------------------------------------------------------------
def make_params(key, input_dim, hidden_dims, kernel_size, num_heads):
    keys = iter(jax.random.split(key, 64))

    def nrm(shape, scale):
        return (scale * jax.random.normal(next(keys), shape)).astype(jnp.float32)

    tcn = []
    in_ch = input_dim
    for out_ch in hidden_dims:
        layer = {
            "w1": nrm((kernel_size * in_ch, out_ch), 0.01),   # (K*Cin, Cout)
            "b1": nrm((1, out_ch), 0.01),
            "w2": nrm((kernel_size * out_ch, out_ch), 0.01),  # (K*Cout, Cout)
            "b2": nrm((1, out_ch), 0.01),
        }
        if in_ch != out_ch:
            layer["down_w"] = nrm((in_ch, out_ch), 0.01)
            layer["down_b"] = nrm((1, out_ch), 0.01)
        tcn.append(layer)
        in_ch = out_ch

    D = hidden_dims[-1]
    hyp = {"tcn": tcn,
           "l1_w": nrm((D, D), 0.1), "l1_b": nrm((1, D), 0.1),
           "l2_w": nrm((D, D), 0.1), "l2_b": nrm((1, D), 0.1)}

    def gat_params():
        return {"w_src": nrm((input_dim, num_heads * input_dim), 0.1),
                "att_src": nrm((num_heads, input_dim), 0.1),
                "att_dst": nrm((num_heads, input_dim), 0.1),
                "bias": nrm((1, num_heads * input_dim), 0.1),
                "w_lin": nrm((num_heads * input_dim, input_dim), 0.1)}

    dec = {"gat1": gat_params(),
           "lin1_w": nrm((input_dim, input_dim), 0.1),
           "lin1_b": nrm((1, input_dim), 0.1),
           "ln_g": jnp.ones((1, input_dim), jnp.float32),
           "ln_b": jnp.zeros((1, input_dim), jnp.float32),
           "gat2": gat_params(),
           "lin2_w": nrm((input_dim, input_dim), 0.1),
           "lin2_b": nrm((1, input_dim), 0.1)}
    # TODO(synk): lin3_1 / lin3_2 of HSC_2 are defined but unused in forward -> omitted.
    return {"hyp": hyp, "dec": dec}


# ----------------------------------------------------------------------------
if __name__ == "__main__":
    config = dict(input_dim=8, hidden_dim=[16, 8], kernel_size=3,
                  tcn_bias=True, dropout=0.2, num_heads=2,
                  window_size=8, batch_size=3)

    key = jax.random.PRNGKey(0)
    k_par, k_x, k_c = jax.random.split(key, 3)

    params = make_params(k_par, config["input_dim"], config["hidden_dim"],
                         config["kernel_size"], config["num_heads"])
    cnt = build_edge_counts(config["batch_size"], config["window_size"])

    x = jax.random.normal(
        k_x, (config["batch_size"], config["window_size"], config["input_dim"]),
        dtype=jnp.float32)
    c = jax.random.normal(k_c, (config["input_dim"],), dtype=jnp.float32)

    rep, dec = hsc_forward(x, c, params, cnt,
                           config["kernel_size"], config["num_heads"])
    jax.block_until_ready((rep, dec))
    assert rep.shape == x.shape and dec.shape == x.shape
    assert bool(jnp.all(jnp.isfinite(rep))) and bool(jnp.all(jnp.isfinite(dec)))

    # Sanity check against the pure-JAX reference of the same math (loose tolerance
    # because XLA's default f32 matmul precision differs from the in-kernel MXU path).
    rep_xla, dec_xla = hsc_reference(x, c, params, cnt,
                                     config["kernel_size"], config["num_heads"])
    assert bool(jnp.allclose(rep, rep_xla, rtol=5e-2, atol=5e-3)), \
        float(jnp.max(jnp.abs(rep - rep_xla)))
    assert bool(jnp.allclose(dec, dec_xla, rtol=5e-2, atol=5e-3)), \
        float(jnp.max(jnp.abs(dec - dec_xla)))

    print("KERNEL_OK")
</pallas_src>

<mosaic_0001>
module attributes {stable_mosaic.version = 11 : i64} {
  func.func @_hsc_kernel(%arg0: memref<3x8x8xf32, #tpu.memory_space<vmem>>, %arg1: memref<1x8xf32, #tpu.memory_space<vmem>>, %arg2: memref<24x24xf32, #tpu.memory_space<vmem>>, %arg3: memref<24x16xf32, #tpu.memory_space<vmem>>, %arg4: memref<1x16xf32, #tpu.memory_space<vmem>>, %arg5: memref<48x16xf32, #tpu.memory_space<vmem>>, %arg6: memref<1x16xf32, #tpu.memory_space<vmem>>, %arg7: memref<8x16xf32, #tpu.memory_space<vmem>>, %arg8: memref<1x16xf32, #tpu.memory_space<vmem>>, %arg9: memref<48x8xf32, #tpu.memory_space<vmem>>, %arg10: memref<1x8xf32, #tpu.memory_space<vmem>>, %arg11: memref<24x8xf32, #tpu.memory_space<vmem>>, %arg12: memref<1x8xf32, #tpu.memory_space<vmem>>, %arg13: memref<16x8xf32, #tpu.memory_space<vmem>>, %arg14: memref<1x8xf32, #tpu.memory_space<vmem>>, %arg15: memref<8x8xf32, #tpu.memory_space<vmem>>, %arg16: memref<1x8xf32, #tpu.memory_space<vmem>>, %arg17: memref<8x8xf32, #tpu.memory_space<vmem>>, %arg18: memref<1x8xf32, #tpu.memory_space<vmem>>, %arg19: memref<8x16xf32, #tpu.memory_space<vmem>>, %arg20: memref<2x8xf32, #tpu.memory_space<vmem>>, %arg21: memref<2x8xf32, #tpu.memory_space<vmem>>, %arg22: memref<1x16xf32, #tpu.memory_space<vmem>>, %arg23: memref<16x8xf32, #tpu.memory_space<vmem>>, %arg24: memref<8x16xf32, #tpu.memory_space<vmem>>, %arg25: memref<2x8xf32, #tpu.memory_space<vmem>>, %arg26: memref<2x8xf32, #tpu.memory_space<vmem>>, %arg27: memref<1x16xf32, #tpu.memory_space<vmem>>, %arg28: memref<16x8xf32, #tpu.memory_space<vmem>>, %arg29: memref<8x8xf32, #tpu.memory_space<vmem>>, %arg30: memref<1x8xf32, #tpu.memory_space<vmem>>, %arg31: memref<1x8xf32, #tpu.memory_space<vmem>>, %arg32: memref<1x8xf32, #tpu.memory_space<vmem>>, %arg33: memref<8x8xf32, #tpu.memory_space<vmem>>, %arg34: memref<1x8xf32, #tpu.memory_space<vmem>>, %arg35: memref<3x8x8xf32, #tpu.memory_space<vmem>>, %arg36: memref<3x8x8xf32, #tpu.memory_space<vmem>>) attributes {dimension_semantics = [], scalar_prefetch = 0 : i64, scratch_operands = 0 : i64, tpu.core_type = #tpu.core_type<tc>} {
    %c0 = arith.constant 0 : index
    %c0_0 = arith.constant 0 : index
    %c0_1 = arith.constant 0 : index
    %0 = vector.load %arg0[%c0, %c0_0, %c0_1] : memref<3x8x8xf32, #tpu.memory_space<vmem>>, vector<3x8x8xf32>
    %c0_2 = arith.constant 0 : index
    %c0_3 = arith.constant 0 : index
    %1 = vector.load %arg1[%c0_2, %c0_3] : memref<1x8xf32, #tpu.memory_space<vmem>>, vector<1x8xf32>
    %c0_4 = arith.constant 0 : index
    %c0_5 = arith.constant 0 : index
    %2 = vector.load %arg2[%c0_4, %c0_5] : memref<24x24xf32, #tpu.memory_space<vmem>>, vector<24x24xf32>
    %c0_6 = arith.constant 0 : index
    %c0_7 = arith.constant 0 : index
    %3 = vector.load %arg3[%c0_6, %c0_7] : memref<24x16xf32, #tpu.memory_space<vmem>>, vector<24x16xf32>
    %c0_8 = arith.constant 0 : index
    %c0_9 = arith.constant 0 : index
    %4 = vector.load %arg4[%c0_8, %c0_9] : memref<1x16xf32, #tpu.memory_space<vmem>>, vector<1x16xf32>
    %c0_10 = arith.constant 0 : index
    %c0_11 = arith.constant 0 : index
    %5 = vector.load %arg5[%c0_10, %c0_11] : memref<48x16xf32, #tpu.memory_space<vmem>>, vector<48x16xf32>
    %c0_12 = arith.constant 0 : index
    %c0_13 = arith.constant 0 : index
    %6 = vector.load %arg6[%c0_12, %c0_13] : memref<1x16xf32, #tpu.memory_space<vmem>>, vector<1x16xf32>
    %c0_14 = arith.constant 0 : index
    %c0_15 = arith.constant 0 : index
    %7 = vector.load %arg7[%c0_14, %c0_15] : memref<8x16xf32, #tpu.memory_space<vmem>>, vector<8x16xf32>
    %c0_16 = arith.constant 0 : index
    %c0_17 = arith.constant 0 : index
    %8 = vector.load %arg8[%c0_16, %c0_17] : memref<1x16xf32, #tpu.memory_space<vmem>>, vector<1x16xf32>
    %c0_18 = arith.constant 0 : index
    %c0_19 = arith.constant 0 : index
    %9 = vector.load %arg9[%c0_18, %c0_19] : memref<48x8xf32, #tpu.memory_space<vmem>>, vector<48x8xf32>
    %c0_20 = arith.constant 0 : index
    %c0_21 = arith.constant 0 : index
    %10 = vector.load %arg10[%c0_20, %c0_21] : memref<1x8xf32, #tpu.memory_space<vmem>>, vector<1x8xf32>
    %c0_22 = arith.constant 0 : index
    %c0_23 = arith.constant 0 : index
    %11 = vector.load %arg11[%c0_22, %c0_23] : memref<24x8xf32, #tpu.memory_space<vmem>>, vector<24x8xf32>
    %c0_24 = arith.constant 0 : index
    %c0_25 = arith.constant 0 : index
    %12 = vector.load %arg12[%c0_24, %c0_25] : memref<1x8xf32, #tpu.memory_space<vmem>>, vector<1x8xf32>
    %c0_26 = arith.constant 0 : index
    %c0_27 = arith.constant 0 : index
    %13 = vector.load %arg13[%c0_26, %c0_27] : memref<16x8xf32, #tpu.memory_space<vmem>>, vector<16x8xf32>
    %c0_28 = arith.constant 0 : index
    %c0_29 = arith.constant 0 : index
    %14 = vector.load %arg14[%c0_28, %c0_29] : memref<1x8xf32, #tpu.memory_space<vmem>>, vector<1x8xf32>
    %c0_30 = arith.constant 0 : index
    %c0_31 = arith.constant 0 : index
    %15 = vector.load %arg15[%c0_30, %c0_31] : memref<8x8xf32, #tpu.memory_space<vmem>>, vector<8x8xf32>
    %c0_32 = arith.constant 0 : index
    %c0_33 = arith.constant 0 : index
    %16 = vector.load %arg16[%c0_32, %c0_33] : memref<1x8xf32, #tpu.memory_space<vmem>>, vector<1x8xf32>
    %c0_34 = arith.constant 0 : index
    %c0_35 = arith.constant 0 : index
    %17 = vector.load %arg17[%c0_34, %c0_35] : memref<8x8xf32, #tpu.memory_space<vmem>>, vector<8x8xf32>
    %c0_36 = arith.constant 0 : index
    %c0_37 = arith.constant 0 : index
    %18 = vector.load %arg18[%c0_36, %c0_37] : memref<1x8xf32, #tpu.memory_space<vmem>>, vector<1x8xf32>
    %c0_38 = arith.constant 0 : index
    %c0_39 = arith.constant 0 : index
    %19 = vector.load %arg19[%c0_38, %c0_39] : memref<8x16xf32, #tpu.memory_space<vmem>>, vector<8x16xf32>
    %c0_40 = arith.constant 0 : index
    %c0_41 = arith.constant 0 : index
    %20 = vector.load %arg20[%c0_40, %c0_41] : memref<2x8xf32, #tpu.memory_space<vmem>>, vector<2x8xf32>
    %c0_42 = arith.constant 0 : index
    %c0_43 = arith.constant 0 : index
    %21 = vector.load %arg21[%c0_42, %c0_43] : memref<2x8xf32, #tpu.memory_space<vmem>>, vector<2x8xf32>
    %c0_44 = arith.constant 0 : index
    %c0_45 = arith.constant 0 : index
    %22 = vector.load %arg22[%c0_44, %c0_45] : memref<1x16xf32, #tpu.memory_space<vmem>>, vector<1x16xf32>
    %c0_46 = arith.constant 0 : index
    %c0_47 = arith.constant 0 : index
    %23 = vector.load %arg23[%c0_46, %c0_47] : memref<16x8xf32, #tpu.memory_space<vmem>>, vector<16x8xf32>
    %c0_48 = arith.constant 0 : index
    %c0_49 = arith.constant 0 : index
    %24 = vector.load %arg24[%c0_48, %c0_49] : memref<8x16xf32, #tpu.memory_space<vmem>>, vector<8x16xf32>
    %c0_50 = arith.constant 0 : index
    %c0_51 = arith.constant 0 : index
    %25 = vector.load %arg25[%c0_50, %c0_51] : memref<2x8xf32, #tpu.memory_space<vmem>>, vector<2x8xf32>
    %c0_52 = arith.constant 0 : index
    %c0_53 = arith.constant 0 : index
    %26 = vector.load %arg26[%c0_52, %c0_53] : memref<2x8xf32, #tpu.memory_space<vmem>>, vector<2x8xf32>
    %c0_54 = arith.constant 0 : index
    %c0_55 = arith.constant 0 : index
    %27 = vector.load %arg27[%c0_54, %c0_55] : memref<1x16xf32, #tpu.memory_space<vmem>>, vector<1x16xf32>
    %c0_56 = arith.constant 0 : index
    %c0_57 = arith.constant 0 : index
    %28 = vector.load %arg28[%c0_56, %c0_57] : memref<16x8xf32, #tpu.memory_space<vmem>>, vector<16x8xf32>
    %c0_58 = arith.constant 0 : index
    %c0_59 = arith.constant 0 : index
    %29 = vector.load %arg29[%c0_58, %c0_59] : memref<8x8xf32, #tpu.memory_space<vmem>>, vector<8x8xf32>
    %c0_60 = arith.constant 0 : index
    %c0_61 = arith.constant 0 : index
    %30 = vector.load %arg30[%c0_60, %c0_61] : memref<1x8xf32, #tpu.memory_space<vmem>>, vector<1x8xf32>
    %c0_62 = arith.constant 0 : index
    %c0_63 = arith.constant 0 : index
    %31 = vector.load %arg31[%c0_62, %c0_63] : memref<1x8xf32, #tpu.memory_space<vmem>>, vector<1x8xf32>
    %c0_64 = arith.constant 0 : index
    %c0_65 = arith.constant 0 : index
    %32 = vector.load %arg32[%c0_64, %c0_65] : memref<1x8xf32, #tpu.memory_space<vmem>>, vector<1x8xf32>
    %c0_66 = arith.constant 0 : index
    %c0_67 = arith.constant 0 : index
    %33 = vector.load %arg33[%c0_66, %c0_67] : memref<8x8xf32, #tpu.memory_space<vmem>>, vector<8x8xf32>
    %c0_68 = arith.constant 0 : index
    %c0_69 = arith.constant 0 : index
    %34 = vector.load %arg34[%c0_68, %c0_69] : memref<1x8xf32, #tpu.memory_space<vmem>>, vector<1x8xf32>
    %cst = arith.constant 0.000000e+00 : f32
    %35 = vector.broadcast %cst : f32 to vector<3x8x8xf32>
    %36 = tpu.concatenate %35, %0 in 1 : vector<3x8x8xf32>, vector<3x8x8xf32> -> vector<3x16x8xf32>
    %37 = vector.extract_strided_slice %36 {offsets = [0, 6, 0], sizes = [3, 8, 8], strides = [1, 1, 1]} : vector<3x16x8xf32> to vector<3x8x8xf32>
    %38 = vector.extract_strided_slice %36 {offsets = [0, 7, 0], sizes = [3, 8, 8], strides = [1, 1, 1]} : vector<3x16x8xf32> to vector<3x8x8xf32>
    %39 = vector.extract_strided_slice %36 {offsets = [0, 8, 0], sizes = [3, 8, 8], strides = [1, 1, 1]} : vector<3x16x8xf32> to vector<3x8x8xf32>
    %40 = tpu.concatenate %37, %38, %39 in 2 : vector<3x8x8xf32>, vector<3x8x8xf32>, vector<3x8x8xf32> -> vector<3x8x24xf32>
    %41 = vector.shape_cast %40 : vector<3x8x24xf32> to vector<24x24xf32>
    %cst_70 = arith.constant dense<0.000000e+00> : vector<24x16xf32>
    %42 = tpu.matmul %41, %3, %cst_70 {dimension_numbers = #tpu.dot_dimension_numbers<[1], [0], [0], [1], [0, 0, 1, 1], [], []>} : vector<24x24xf32>, vector<24x16xf32>, vector<24x16xf32> -> vector<24x16xf32>
    %43 = vector.broadcast %4 : vector<1x16xf32> to vector<24x16xf32>
    %44 = arith.addf %42, %43 : vector<24x16xf32>
    %45 = vector.shape_cast %44 : vector<24x16xf32> to vector<3x8x16xf32>
    %cst_71 = arith.constant 0.000000e+00 : f32
    %46 = vector.broadcast %cst_71 : f32 to vector<3x8x16xf32>
    %47 = arith.maximumf %45, %46 : vector<3x8x16xf32>
    %48 = vector.shape_cast %0 : vector<3x8x8xf32> to vector<24x8xf32>
    %cst_72 = arith.constant dense<0.000000e+00> : vector<24x16xf32>
    %49 = tpu.matmul %48, %7, %cst_72 {dimension_numbers = #tpu.dot_dimension_numbers<[1], [0], [0], [1], [0, 0, 1, 1], [], []>} : vector<24x8xf32>, vector<8x16xf32>, vector<24x16xf32> -> vector<24x16xf32>
    %50 = vector.broadcast %8 : vector<1x16xf32> to vector<24x16xf32>
    %51 = arith.addf %49, %50 : vector<24x16xf32>
    %52 = vector.shape_cast %51 : vector<24x16xf32> to vector<3x8x16xf32>
    %cst_73 = arith.constant 0.000000e+00 : f32
    %53 = vector.broadcast %cst_73 : f32 to vector<3x8x16xf32>
    %54 = tpu.concatenate %53, %47 in 1 : vector<3x8x16xf32>, vector<3x8x16xf32> -> vector<3x16x16xf32>
    %55 = vector.extract_strided_slice %54 {offsets = [0, 6, 0], sizes = [3, 8, 16], strides = [1, 1, 1]} : vector<3x16x16xf32> to vector<3x8x16xf32>
    %56 = vector.extract_strided_slice %54 {offsets = [0, 7, 0], sizes = [3, 8, 16], strides = [1, 1, 1]} : vector<3x16x16xf32> to vector<3x8x16xf32>
    %57 = vector.extract_strided_slice %54 {offsets = [0, 8, 0], sizes = [3, 8, 16], strides = [1, 1, 1]} : vector<3x16x16xf32> to vector<3x8x16xf32>
    %58 = tpu.concatenate %55, %56, %57 in 2 : vector<3x8x16xf32>, vector<3x8x16xf32>, vector<3x8x16xf32> -> vector<3x8x48xf32>
    %59 = vector.shape_cast %58 : vector<3x8x48xf32> to vector<24x48xf32>
    %cst_74 = arith.constant dense<0.000000e+00> : vector<24x16xf32>
    %60 = tpu.matmul %59, %5, %cst_74 {dimension_numbers = #tpu.dot_dimension_numbers<[1], [0], [0], [1], [0, 0, 1, 1], [], []>} : vector<24x48xf32>, vector<48x16xf32>, vector<24x16xf32> -> vector<24x16xf32>
    %61 = vector.broadcast %6 : vector<1x16xf32> to vector<24x16xf32>
    %62 = arith.addf %60, %61 : vector<24x16xf32>
    %63 = vector.shape_cast %62 : vector<24x16xf32> to vector<3x8x16xf32>
    %cst_75 = arith.constant 0.000000e+00 : f32
    %64 = vector.broadcast %cst_75 : f32 to vector<3x8x16xf32>
    %65 = arith.maximumf %63, %64 : vector<3x8x16xf32>
    %66 = arith.addf %65, %52 : vector<3x8x16xf32>
    %cst_76 = arith.constant 0.000000e+00 : f32
    %67 = vector.broadcast %cst_76 : f32 to vector<3x8x16xf32>
    %68 = arith.maximumf %66, %67 : vector<3x8x16xf32>
    %cst_77 = arith.constant 0.000000e+00 : f32
    %69 = vector.broadcast %cst_77 : f32 to vector<3x8x16xf32>
    %70 = tpu.concatenate %69, %68 in 1 : vector<3x8x16xf32>, vector<3x8x16xf32> -> vector<3x16x16xf32>
    %71 = vector.extract_strided_slice %70 {offsets = [0, 4, 0], sizes = [3, 8, 16], strides = [1, 1, 1]} : vector<3x16x16xf32> to vector<3x8x16xf32>
    %72 = vector.extract_strided_slice %70 {offsets = [0, 6, 0], sizes = [3, 8, 16], strides = [1, 1, 1]} : vector<3x16x16xf32> to vector<3x8x16xf32>
    %73 = vector.extract_strided_slice %70 {offsets = [0, 8, 0], sizes = [3, 8, 16], strides = [1, 1, 1]} : vector<3x16x16xf32> to vector<3x8x16xf32>
    %74 = tpu.concatenate %71, %72, %73 in 2 : vector<3x8x16xf32>, vector<3x8x16xf32>, vector<3x8x16xf32> -> vector<3x8x48xf32>
    %75 = vector.shape_cast %74 : vector<3x8x48xf32> to vector<24x48xf32>
    %cst_78 = arith.constant dense<0.000000e+00> : vector<24x8xf32>
    %76 = tpu.matmul %75, %9, %cst_78 {dimension_numbers = #tpu.dot_dimension_numbers<[1], [0], [0], [1], [0, 0, 1, 1], [], []>} : vector<24x48xf32>, vector<48x8xf32>, vector<24x8xf32> -> vector<24x8xf32>
    %77 = vector.broadcast %10 : vector<1x8xf32> to vector<24x8xf32>
    %78 = arith.addf %76, %77 : vector<24x8xf32>
    %79 = vector.shape_cast %78 : vector<24x8xf32> to vector<3x8x8xf32>
    %cst_79 = arith.constant 0.000000e+00 : f32
    %80 = vector.broadcast %cst_79 : f32 to vector<3x8x8xf32>
    %81 = arith.maximumf %79, %80 : vector<3x8x8xf32>
    %82 = vector.shape_cast %68 : vector<3x8x16xf32> to vector<24x16xf32>
    %cst_80 = arith.constant dense<0.000000e+00> : vector<24x8xf32>
    %83 = tpu.matmul %82, %13, %cst_80 {dimension_numbers = #tpu.dot_dimension_numbers<[1], [0], [0], [1], [0, 0, 1, 1], [], []>} : vector<24x16xf32>, vector<16x8xf32>, vector<24x8xf32> -> vector<24x8xf32>
    %84 = vector.broadcast %14 : vector<1x8xf32> to vector<24x8xf32>
    %85 = arith.addf %83, %84 : vector<24x8xf32>
    %86 = vector.shape_cast %85 : vector<24x8xf32> to vector<3x8x8xf32>
    %cst_81 = arith.constant 0.000000e+00 : f32
    %87 = vector.broadcast %cst_81 : f32 to vector<3x8x8xf32>
    %88 = tpu.concatenate %87, %81 in 1 : vector<3x8x8xf32>, vector<3x8x8xf32> -> vector<3x16x8xf32>
    %89 = vector.extract_strided_slice %88 {offsets = [0, 4, 0], sizes = [3, 8, 8], strides = [1, 1, 1]} : vector<3x16x8xf32> to vector<3x8x8xf32>
    %90 = vector.extract_strided_slice %88 {offsets = [0, 6, 0], sizes = [3, 8, 8], strides = [1, 1, 1]} : vector<3x16x8xf32> to vector<3x8x8xf32>
    %91 = vector.extract_strided_slice %88 {offsets = [0, 8, 0], sizes = [3, 8, 8], strides = [1, 1, 1]} : vector<3x16x8xf32> to vector<3x8x8xf32>
    %92 = tpu.concatenate %89, %90, %91 in 2 : vector<3x8x8xf32>, vector<3x8x8xf32>, vector<3x8x8xf32> -> vector<3x8x24xf32>
    %93 = vector.shape_cast %92 : vector<3x8x24xf32> to vector<24x24xf32>
    %cst_82 = arith.constant dense<0.000000e+00> : vector<24x8xf32>
    %94 = tpu.matmul %93, %11, %cst_82 {dimension_numbers = #tpu.dot_dimension_numbers<[1], [0], [0], [1], [0, 0, 1, 1], [], []>} : vector<24x24xf32>, vector<24x8xf32>, vector<24x8xf32> -> vector<24x8xf32>
    %95 = vector.broadcast %12 : vector<1x8xf32> to vector<24x8xf32>
    %96 = arith.addf %94, %95 : vector<24x8xf32>
    %97 = vector.shape_cast %96 : vector<24x8xf32> to vector<3x8x8xf32>
    %cst_83 = arith.constant 0.000000e+00 : f32
    %98 = vector.broadcast %cst_83 : f32 to vector<3x8x8xf32>
    %99 = arith.maximumf %97, %98 : vector<3x8x8xf32>
    %100 = arith.addf %99, %86 : vector<3x8x8xf32>
    %cst_84 = arith.constant 0.000000e+00 : f32
    %101 = vector.broadcast %cst_84 : f32 to vector<3x8x8xf32>
    %102 = arith.maximumf %100, %101 : vector<3x8x8xf32>
    %103 = vector.shape_cast %102 : vector<3x8x8xf32> to vector<24x8xf32>
    %cst_85 = arith.constant dense<0.000000e+00> : vector<24x8xf32>
    %104 = tpu.matmul %103, %15, %cst_85 {dimension_numbers = #tpu.dot_dimension_numbers<[1], [0], [0], [1], [0, 0, 1, 1], [], []>} : vector<24x8xf32>, vector<8x8xf32>, vector<24x8xf32> -> vector<24x8xf32>
    %105 = vector.broadcast %16 : vector<1x8xf32> to vector<24x8xf32>
    %106 = arith.addf %104, %105 : vector<24x8xf32>
    %cst_86 = arith.constant 0.000000e+00 : f32
    %107 = vector.broadcast %cst_86 : f32 to vector<24x8xf32>
    %108 = arith.cmpf oge, %106, %107 : vector<24x8xf32>
    %cst_87 = arith.constant 0.00999999977 : f32
    %109 = vector.broadcast %cst_87 : f32 to vector<24x8xf32>
    %110 = arith.mulf %109, %106 : vector<24x8xf32>
    %111 = arith.select %108, %106, %110 : vector<24x8xi1>, vector<24x8xf32>
    %cst_88 = arith.constant dense<0.000000e+00> : vector<24x8xf32>
    %112 = tpu.matmul %111, %17, %cst_88 {dimension_numbers = #tpu.dot_dimension_numbers<[1], [0], [0], [1], [0, 0, 1, 1], [], []>} : vector<24x8xf32>, vector<8x8xf32>, vector<24x8xf32> -> vector<24x8xf32>
    %113 = vector.broadcast %18 : vector<1x8xf32> to vector<24x8xf32>
    %114 = arith.addf %112, %113 : vector<24x8xf32>
    %115 = vector.broadcast %1 : vector<1x8xf32> to vector<24x8xf32>
    %116 = arith.subf %114, %115 : vector<24x8xf32>
    %cst_89 = arith.constant dense<0.000000e+00> : vector<24x16xf32>
    %117 = tpu.matmul %116, %19, %cst_89 {dimension_numbers = #tpu.dot_dimension_numbers<[1], [0], [0], [1], [0, 0, 1, 1], [], []>} : vector<24x8xf32>, vector<8x16xf32>, vector<24x16xf32> -> vector<24x16xf32>
    %cst_90 = arith.constant 0.000000e+00 : f32
    %118 = vector.broadcast %cst_90 : f32 to vector<24x24xf32>
    %119 = arith.cmpf ogt, %2, %118 : vector<24x24xf32>
    %cst_91 = arith.constant 0.000000e+00 : f32
    %120 = vector.broadcast %cst_91 : f32 to vector<24x8xf32>
    %121 = vector.extract_strided_slice %117 {offsets = [0, 0], sizes = [24, 8], strides = [1, 1]} : vector<24x16xf32> to vector<24x8xf32>
    %122 = vector.extract_strided_slice %20 {offsets = [0, 0], sizes = [1, 8], strides = [1, 1]} : vector<2x8xf32> to vector<1x8xf32>
    %123 = vector.broadcast %122 : vector<1x8xf32> to vector<24x8xf32>
    %124 = arith.mulf %121, %123 : vector<24x8xf32>
    %cst_92 = arith.constant dense<0.000000e+00> : vector<24xf32>
    %125 = vector.multi_reduction <add>, %124, %cst_92 [1] : vector<24x8xf32> to vector<24xf32>
    %126 = vector.shape_cast %125 : vector<24xf32> to vector<24x1xf32>
    %127 = vector.extract_strided_slice %21 {offsets = [0, 0], sizes = [1, 8], strides = [1, 1]} : vector<2x8xf32> to vector<1x8xf32>
    %128 = vector.broadcast %127 : vector<1x8xf32> to vector<24x8xf32>
    %129 = arith.mulf %121, %128 : vector<24x8xf32>
    %cst_93 = arith.constant dense<0.000000e+00> : vector<24xf32>
    %130 = vector.multi_reduction <add>, %129, %cst_93 [1] : vector<24x8xf32> to vector<24xf32>
    %131 = vector.shape_cast %130 : vector<24xf32> to vector<24x1xf32>
    %132 = tpu.transpose %126, [1, 0] : vector<24x1xf32> -> vector<1x24xf32>
    %133 = vector.broadcast %131 : vector<24x1xf32> to vector<24x24xf32>
    %134 = vector.broadcast %132 : vector<1x24xf32> to vector<24x24xf32>
    %135 = arith.addf %133, %134 : vector<24x24xf32>
    %cst_94 = arith.constant 0.000000e+00 : f32
    %136 = vector.broadcast %cst_94 : f32 to vector<24x24xf32>
    %137 = arith.cmpf oge, %135, %136 : vector<24x24xf32>
    %cst_95 = arith.constant 2.000000e-01 : f32
    %138 = vector.broadcast %cst_95 : f32 to vector<24x24xf32>
    %139 = arith.mulf %138, %135 : vector<24x24xf32>
    %140 = arith.select %137, %135, %139 : vector<24x24xi1>, vector<24x24xf32>
    %cst_96 = arith.constant -1.000000e+30 : f32
    %141 = vector.broadcast %cst_96 : f32 to vector<24x24xf32>
    %142 = arith.select %119, %140, %141 : vector<24x24xi1>, vector<24x24xf32>
    %cst_97 = arith.constant dense<0xFF800000> : vector<24xf32>
    %143 = vector.multi_reduction <maximumf>, %142, %cst_97 [1] : vector<24x24xf32> to vector<24xf32>
    %144 = vector.shape_cast %143 : vector<24xf32> to vector<24x1xf32>
    %145 = vector.broadcast %144 : vector<24x1xf32> to vector<24x24xf32>
    %146 = arith.subf %142, %145 : vector<24x24xf32>
    %147 = math.exp %146 : vector<24x24xf32>
    %148 = arith.mulf %2, %147 : vector<24x24xf32>
    %cst_98 = arith.constant dense<0.000000e+00> : vector<24xf32>
    %149 = vector.multi_reduction <add>, %148, %cst_98 [1] : vector<24x24xf32> to vector<24xf32>
    %150 = vector.shape_cast %149 : vector<24xf32> to vector<24x1xf32>
    %151 = vector.broadcast %150 : vector<24x1xf32> to vector<24x24xf32>
    %152 = arith.divf %148, %151 : vector<24x24xf32>
    %cst_99 = arith.constant dense<0.000000e+00> : vector<24x8xf32>
    %153 = tpu.matmul %152, %121, %cst_99 {dimension_numbers = #tpu.dot_dimension_numbers<[1], [0], [0], [1], [0, 0, 1, 1], [], []>} : vector<24x24xf32>, vector<24x8xf32>, vector<24x8xf32> -> vector<24x8xf32>
    %154 = vector.extract_strided_slice %22 {offsets = [0, 0], sizes = [1, 8], strides = [1, 1]} : vector<1x16xf32> to vector<1x8xf32>
    %155 = vector.broadcast %154 : vector<1x8xf32> to vector<24x8xf32>
    %156 = arith.addf %153, %155 : vector<24x8xf32>
    %157 = vector.extract_strided_slice %23 {offsets = [0, 0], sizes = [8, 8], strides = [1, 1]} : vector<16x8xf32> to vector<8x8xf32>
    %cst_100 = arith.constant dense<0.000000e+00> : vector<24x8xf32>
    %158 = tpu.matmul %156, %157, %cst_100 {dimension_numbers = #tpu.dot_dimension_numbers<[1], [0], [0], [1], [0, 0, 1, 1], [], []>} : vector<24x8xf32>, vector<8x8xf32>, vector<24x8xf32> -> vector<24x8xf32>
    %159 = arith.addf %120, %158 : vector<24x8xf32>
    %160 = vector.extract_strided_slice %117 {offsets = [0, 8], sizes = [24, 8], strides = [1, 1]} : vector<24x16xf32> to vector<24x8xf32>
    %161 = vector.extract_strided_slice %20 {offsets = [1, 0], sizes = [1, 8], strides = [1, 1]} : vector<2x8xf32> to vector<1x8xf32>
    %162 = vector.broadcast %161 : vector<1x8xf32> to vector<24x8xf32>
    %163 = arith.mulf %160, %162 : vector<24x8xf32>
    %cst_101 = arith.constant dense<0.000000e+00> : vector<24xf32>
    %164 = vector.multi_reduction <add>, %163, %cst_101 [1] : vector<24x8xf32> to vector<24xf32>
    %165 = vector.shape_cast %164 : vector<24xf32> to vector<24x1xf32>
    %166 = vector.extract_strided_slice %21 {offsets = [1, 0], sizes = [1, 8], strides = [1, 1]} : vector<2x8xf32> to vector<1x8xf32>
    %167 = vector.broadcast %166 : vector<1x8xf32> to vector<24x8xf32>
    %168 = arith.mulf %160, %167 : vector<24x8xf32>
    %cst_102 = arith.constant dense<0.000000e+00> : vector<24xf32>
    %169 = vector.multi_reduction <add>, %168, %cst_102 [1] : vector<24x8xf32> to vector<24xf32>
    %170 = vector.shape_cast %169 : vector<24xf32> to vector<24x1xf32>
    %171 = tpu.transpose %165, [1, 0] : vector<24x1xf32> -> vector<1x24xf32>
    %172 = vector.broadcast %170 : vector<24x1xf32> to vector<24x24xf32>
    %173 = vector.broadcast %171 : vector<1x24xf32> to vector<24x24xf32>
    %174 = arith.addf %172, %173 : vector<24x24xf32>
    %cst_103 = arith.constant 0.000000e+00 : f32
    %175 = vector.broadcast %cst_103 : f32 to vector<24x24xf32>
    %176 = arith.cmpf oge, %174, %175 : vector<24x24xf32>
    %cst_104 = arith.constant 2.000000e-01 : f32
    %177 = vector.broadcast %cst_104 : f32 to vector<24x24xf32>
    %178 = arith.mulf %177, %174 : vector<24x24xf32>
    %179 = arith.select %176, %174, %178 : vector<24x24xi1>, vector<24x24xf32>
    %cst_105 = arith.constant -1.000000e+30 : f32
    %180 = vector.broadcast %cst_105 : f32 to vector<24x24xf32>
    %181 = arith.select %119, %179, %180 : vector<24x24xi1>, vector<24x24xf32>
    %cst_106 = arith.constant dense<0xFF800000> : vector<24xf32>
    %182 = vector.multi_reduction <maximumf>, %181, %cst_106 [1] : vector<24x24xf32> to vector<24xf32>
    %183 = vector.shape_cast %182 : vector<24xf32> to vector<24x1xf32>
    %184 = vector.broadcast %183 : vector<24x1xf32> to vector<24x24xf32>
    %185 = arith.subf %181, %184 : vector<24x24xf32>
    %186 = math.exp %185 : vector<24x24xf32>
    %187 = arith.mulf %2, %186 : vector<24x24xf32>
    %cst_107 = arith.constant dense<0.000000e+00> : vector<24xf32>
    %188 = vector.multi_reduction <add>, %187, %cst_107 [1] : vector<24x24xf32> to vector<24xf32>
    %189 = vector.shape_cast %188 : vector<24xf32> to vector<24x1xf32>
    %190 = vector.broadcast %189 : vector<24x1xf32> to vector<24x24xf32>
    %191 = arith.divf %187, %190 : vector<24x24xf32>
    %cst_108 = arith.constant dense<0.000000e+00> : vector<24x8xf32>
    %192 = tpu.matmul %191, %160, %cst_108 {dimension_numbers = #tpu.dot_dimension_numbers<[1], [0], [0], [1], [0, 0, 1, 1], [], []>} : vector<24x24xf32>, vector<24x8xf32>, vector<24x8xf32> -> vector<24x8xf32>
    %193 = vector.extract_strided_slice %22 {offsets = [0, 8], sizes = [1, 8], strides = [1, 1]} : vector<1x16xf32> to vector<1x8xf32>
    %194 = vector.broadcast %193 : vector<1x8xf32> to vector<24x8xf32>
    %195 = arith.addf %192, %194 : vector<24x8xf32>
    %196 = vector.extract_strided_slice %23 {offsets = [8, 0], sizes = [8, 8], strides = [1, 1]} : vector<16x8xf32> to vector<8x8xf32>
    %cst_109 = arith.constant dense<0.000000e+00> : vector<24x8xf32>
    %197 = tpu.matmul %195, %196, %cst_109 {dimension_numbers = #tpu.dot_dimension_numbers<[1], [0], [0], [1], [0, 0, 1, 1], [], []>} : vector<24x8xf32>, vector<8x8xf32>, vector<24x8xf32> -> vector<24x8xf32>
    %198 = arith.addf %159, %197 : vector<24x8xf32>
    %cst_110 = arith.constant dense<0.000000e+00> : vector<24x8xf32>
    %199 = tpu.matmul %198, %29, %cst_110 {dimension_numbers = #tpu.dot_dimension_numbers<[1], [0], [0], [1], [0, 0, 1, 1], [], []>} : vector<24x8xf32>, vector<8x8xf32>, vector<24x8xf32> -> vector<24x8xf32>
    %200 = vector.broadcast %30 : vector<1x8xf32> to vector<24x8xf32>
    %201 = arith.addf %199, %200 : vector<24x8xf32>
    %cst_111 = arith.constant 0.000000e+00 : f32
    %202 = vector.broadcast %cst_111 : f32 to vector<24x8xf32>
    %203 = arith.cmpf oge, %201, %202 : vector<24x8xf32>
    %cst_112 = arith.constant 0.00999999977 : f32
    %204 = vector.broadcast %cst_112 : f32 to vector<24x8xf32>
    %205 = arith.mulf %204, %201 : vector<24x8xf32>
    %206 = arith.select %203, %201, %205 : vector<24x8xi1>, vector<24x8xf32>
    %cst_113 = arith.constant dense<0.000000e+00> : vector<24xf32>
    %207 = vector.multi_reduction <add>, %206, %cst_113 [1] : vector<24x8xf32> to vector<24xf32>
    %208 = vector.shape_cast %207 : vector<24xf32> to vector<24x1xf32>
    %cst_114 = arith.constant 8.000000e+00 : f32
    %209 = vector.broadcast %cst_114 : f32 to vector<24x1xf32>
    %210 = arith.divf %208, %209 : vector<24x1xf32>
    %211 = vector.broadcast %210 : vector<24x1xf32> to vector<24x8xf32>
    %212 = arith.subf %206, %211 : vector<24x8xf32>
    %213 = arith.mulf %212, %212 : vector<24x8xf32>
    %cst_115 = arith.constant dense<0.000000e+00> : vector<24xf32>
    %214 = vector.multi_reduction <add>, %213, %cst_115 [1] : vector<24x8xf32> to vector<24xf32>
    %215 = vector.shape_cast %214 : vector<24xf32> to vector<24x1xf32>
    %cst_116 = arith.constant 8.000000e+00 : f32
    %216 = vector.broadcast %cst_116 : f32 to vector<24x1xf32>
    %217 = arith.divf %215, %216 : vector<24x1xf32>
    %cst_117 = arith.constant 9.99999974E-6 : f32
    %218 = vector.broadcast %cst_117 : f32 to vector<24x1xf32>
    %219 = arith.addf %217, %218 : vector<24x1xf32>
    %220 = math.rsqrt %219 : vector<24x1xf32>
    %221 = vector.broadcast %220 : vector<24x1xf32> to vector<24x8xf32>
    %222 = arith.mulf %212, %221 : vector<24x8xf32>
    %223 = vector.broadcast %31 : vector<1x8xf32> to vector<24x8xf32>
    %224 = arith.mulf %222, %223 : vector<24x8xf32>
    %225 = vector.broadcast %32 : vector<1x8xf32> to vector<24x8xf32>
    %226 = arith.addf %224, %225 : vector<24x8xf32>
    %cst_118 = arith.constant dense<0.000000e+00> : vector<24x16xf32>
    %227 = tpu.matmul %226, %24, %cst_118 {dimension_numbers = #tpu.dot_dimension_numbers<[1], [0], [0], [1], [0, 0, 1, 1], [], []>} : vector<24x8xf32>, vector<8x16xf32>, vector<24x16xf32> -> vector<24x16xf32>
    %cst_119 = arith.constant 0.000000e+00 : f32
    %228 = vector.broadcast %cst_119 : f32 to vector<24x24xf32>
    %229 = arith.cmpf ogt, %2, %228 : vector<24x24xf32>
    %cst_120 = arith.constant 0.000000e+00 : f32
    %230 = vector.broadcast %cst_120 : f32 to vector<24x8xf32>
    %231 = vector.extract_strided_slice %227 {offsets = [0, 0], sizes = [24, 8], strides = [1, 1]} : vector<24x16xf32> to vector<24x8xf32>
    %232 = vector.extract_strided_slice %25 {offsets = [0, 0], sizes = [1, 8], strides = [1, 1]} : vector<2x8xf32> to vector<1x8xf32>
    %233 = vector.broadcast %232 : vector<1x8xf32> to vector<24x8xf32>
    %234 = arith.mulf %231, %233 : vector<24x8xf32>
    %cst_121 = arith.constant dense<0.000000e+00> : vector<24xf32>
    %235 = vector.multi_reduction <add>, %234, %cst_121 [1] : vector<24x8xf32> to vector<24xf32>
    %236 = vector.shape_cast %235 : vector<24xf32> to vector<24x1xf32>
    %237 = vector.extract_strided_slice %26 {offsets = [0, 0], sizes = [1, 8], strides = [1, 1]} : vector<2x8xf32> to vector<1x8xf32>
    %238 = vector.broadcast %237 : vector<1x8xf32> to vector<24x8xf32>
    %239 = arith.mulf %231, %238 : vector<24x8xf32>
    %cst_122 = arith.constant dense<0.000000e+00> : vector<24xf32>
    %240 = vector.multi_reduction <add>, %239, %cst_122 [1] : vector<24x8xf32> to vector<24xf32>
    %241 = vector.shape_cast %240 : vector<24xf32> to vector<24x1xf32>
    %242 = tpu.transpose %236, [1, 0] : vector<24x1xf32> -> vector<1x24xf32>
    %243 = vector.broadcast %241 : vector<24x1xf32> to vector<24x24xf32>
    %244 = vector.broadcast %242 : vector<1x24xf32> to vector<24x24xf32>
    %245 = arith.addf %243, %244 : vector<24x24xf32>
    %cst_123 = arith.constant 0.000000e+00 : f32
    %246 = vector.broadcast %cst_123 : f32 to vector<24x24xf32>
    %247 = arith.cmpf oge, %245, %246 : vector<24x24xf32>
    %cst_124 = arith.constant 2.000000e-01 : f32
    %248 = vector.broadcast %cst_124 : f32 to vector<24x24xf32>
    %249 = arith.mulf %248, %245 : vector<24x24xf32>
    %250 = arith.select %247, %245, %249 : vector<24x24xi1>, vector<24x24xf32>
    %cst_125 = arith.constant -1.000000e+30 : f32
    %251 = vector.broadcast %cst_125 : f32 to vector<24x24xf32>
    %252 = arith.select %229, %250, %251 : vector<24x24xi1>, vector<24x24xf32>
    %cst_126 = arith.constant dense<0xFF800000> : vector<24xf32>
    %253 = vector.multi_reduction <maximumf>, %252, %cst_126 [1] : vector<24x24xf32> to vector<24xf32>
    %254 = vector.shape_cast %253 : vector<24xf32> to vector<24x1xf32>
    %255 = vector.broadcast %254 : vector<24x1xf32> to vector<24x24xf32>
    %256 = arith.subf %252, %255 : vector<24x24xf32>
    %257 = math.exp %256 : vector<24x24xf32>
    %258 = arith.mulf %2, %257 : vector<24x24xf32>
    %cst_127 = arith.constant dense<0.000000e+00> : vector<24xf32>
    %259 = vector.multi_reduction <add>, %258, %cst_127 [1] : vector<24x24xf32> to vector<24xf32>
    %260 = vector.shape_cast %259 : vector<24xf32> to vector<24x1xf32>
    %261 = vector.broadcast %260 : vector<24x1xf32> to vector<24x24xf32>
    %262 = arith.divf %258, %261 : vector<24x24xf32>
    %cst_128 = arith.constant dense<0.000000e+00> : vector<24x8xf32>
    %263 = tpu.matmul %262, %231, %cst_128 {dimension_numbers = #tpu.dot_dimension_numbers<[1], [0], [0], [1], [0, 0, 1, 1], [], []>} : vector<24x24xf32>, vector<24x8xf32>, vector<24x8xf32> -> vector<24x8xf32>
    %264 = vector.extract_strided_slice %27 {offsets = [0, 0], sizes = [1, 8], strides = [1, 1]} : vector<1x16xf32> to vector<1x8xf32>
    %265 = vector.broadcast %264 : vector<1x8xf32> to vector<24x8xf32>
    %266 = arith.addf %263, %265 : vector<24x8xf32>
    %267 = vector.extract_strided_slice %28 {offsets = [0, 0], sizes = [8, 8], strides = [1, 1]} : vector<16x8xf32> to vector<8x8xf32>
    %cst_129 = arith.constant dense<0.000000e+00> : vector<24x8xf32>
    %268 = tpu.matmul %266, %267, %cst_129 {dimension_numbers = #tpu.dot_dimension_numbers<[1], [0], [0], [1], [0, 0, 1, 1], [], []>} : vector<24x8xf32>, vector<8x8xf32>, vector<24x8xf32> -> vector<24x8xf32>
    %269 = arith.addf %230, %268 : vector<24x8xf32>
    %270 = vector.extract_strided_slice %227 {offsets = [0, 8], sizes = [24, 8], strides = [1, 1]} : vector<24x16xf32> to vector<24x8xf32>
    %271 = vector.extract_strided_slice %25 {offsets = [1, 0], sizes = [1, 8], strides = [1, 1]} : vector<2x8xf32> to vector<1x8xf32>
    %272 = vector.broadcast %271 : vector<1x8xf32> to vector<24x8xf32>
    %273 = arith.mulf %270, %272 : vector<24x8xf32>
    %cst_130 = arith.constant dense<0.000000e+00> : vector<24xf32>
    %274 = vector.multi_reduction <add>, %273, %cst_130 [1] : vector<24x8xf32> to vector<24xf32>
    %275 = vector.shape_cast %274 : vector<24xf32> to vector<24x1xf32>
    %276 = vector.extract_strided_slice %26 {offsets = [1, 0], sizes = [1, 8], strides = [1, 1]} : vector<2x8xf32> to vector<1x8xf32>
    %277 = vector.broadcast %276 : vector<1x8xf32> to vector<24x8xf32>
    %278 = arith.mulf %270, %277 : vector<24x8xf32>
    %cst_131 = arith.constant dense<0.000000e+00> : vector<24xf32>
    %279 = vector.multi_reduction <add>, %278, %cst_131 [1] : vector<24x8xf32> to vector<24xf32>
    %280 = vector.shape_cast %279 : vector<24xf32> to vector<24x1xf32>
    %281 = tpu.transpose %275, [1, 0] : vector<24x1xf32> -> vector<1x24xf32>
    %282 = vector.broadcast %280 : vector<24x1xf32> to vector<24x24xf32>
    %283 = vector.broadcast %281 : vector<1x24xf32> to vector<24x24xf32>
    %284 = arith.addf %282, %283 : vector<24x24xf32>
    %cst_132 = arith.constant 0.000000e+00 : f32
    %285 = vector.broadcast %cst_132 : f32 to vector<24x24xf32>
    %286 = arith.cmpf oge, %284, %285 : vector<24x24xf32>
    %cst_133 = arith.constant 2.000000e-01 : f32
    %287 = vector.broadcast %cst_133 : f32 to vector<24x24xf32>
    %288 = arith.mulf %287, %284 : vector<24x24xf32>
    %289 = arith.select %286, %284, %288 : vector<24x24xi1>, vector<24x24xf32>
    %cst_134 = arith.constant -1.000000e+30 : f32
    %290 = vector.broadcast %cst_134 : f32 to vector<24x24xf32>
    %291 = arith.select %229, %289, %290 : vector<24x24xi1>, vector<24x24xf32>
    %cst_135 = arith.constant dense<0xFF800000> : vector<24xf32>
    %292 = vector.multi_reduction <maximumf>, %291, %cst_135 [1] : vector<24x24xf32> to vector<24xf32>
    %293 = vector.shape_cast %292 : vector<24xf32> to vector<24x1xf32>
    %294 = vector.broadcast %293 : vector<24x1xf32> to vector<24x24xf32>
    %295 = arith.subf %291, %294 : vector<24x24xf32>
    %296 = math.exp %295 : vector<24x24xf32>
    %297 = arith.mulf %2, %296 : vector<24x24xf32>
    %cst_136 = arith.constant dense<0.000000e+00> : vector<24xf32>
    %298 = vector.multi_reduction <add>, %297, %cst_136 [1] : vector<24x24xf32> to vector<24xf32>
    %299 = vector.shape_cast %298 : vector<24xf32> to vector<24x1xf32>
    %300 = vector.broadcast %299 : vector<24x1xf32> to vector<24x24xf32>
    %301 = arith.divf %297, %300 : vector<24x24xf32>
    %cst_137 = arith.constant dense<0.000000e+00> : vector<24x8xf32>
    %302 = tpu.matmul %301, %270, %cst_137 {dimension_numbers = #tpu.dot_dimension_numbers<[1], [0], [0], [1], [0, 0, 1, 1], [], []>} : vector<24x24xf32>, vector<24x8xf32>, vector<24x8xf32> -> vector<24x8xf32>
    %303 = vector.extract_strided_slice %27 {offsets = [0, 8], sizes = [1, 8], strides = [1, 1]} : vector<1x16xf32> to vector<1x8xf32>
    %304 = vector.broadcast %303 : vector<1x8xf32> to vector<24x8xf32>
    %305 = arith.addf %302, %304 : vector<24x8xf32>
    %306 = vector.extract_strided_slice %28 {offsets = [8, 0], sizes = [8, 8], strides = [1, 1]} : vector<16x8xf32> to vector<8x8xf32>
    %cst_138 = arith.constant dense<0.000000e+00> : vector<24x8xf32>
    %307 = tpu.matmul %305, %306, %cst_138 {dimension_numbers = #tpu.dot_dimension_numbers<[1], [0], [0], [1], [0, 0, 1, 1], [], []>} : vector<24x8xf32>, vector<8x8xf32>, vector<24x8xf32> -> vector<24x8xf32>
    %308 = arith.addf %269, %307 : vector<24x8xf32>
    %cst_139 = arith.constant dense<0.000000e+00> : vector<24x8xf32>
    %309 = tpu.matmul %308, %33, %cst_139 {dimension_numbers = #tpu.dot_dimension_numbers<[1], [0], [0], [1], [0, 0, 1, 1], [], []>} : vector<24x8xf32>, vector<8x8xf32>, vector<24x8xf32> -> vector<24x8xf32>
    %310 = vector.broadcast %34 : vector<1x8xf32> to vector<24x8xf32>
    %311 = arith.addf %309, %310 : vector<24x8xf32>
    %cst_140 = arith.constant 0.000000e+00 : f32
    %312 = vector.broadcast %cst_140 : f32 to vector<24x8xf32>
    %313 = arith.cmpf oge, %311, %312 : vector<24x8xf32>
    %cst_141 = arith.constant 0.00999999977 : f32
    %314 = vector.broadcast %cst_141 : f32 to vector<24x8xf32>
    %315 = arith.mulf %314, %311 : vector<24x8xf32>
    %316 = arith.select %313, %311, %315 : vector<24x8xi1>, vector<24x8xf32>
    %317 = vector.shape_cast %114 : vector<24x8xf32> to vector<3x8x8xf32>
    %c0_142 = arith.constant 0 : index
    %c0_143 = arith.constant 0 : index
    %c0_144 = arith.constant 0 : index
    %318 = vector.load %arg35[%c0_142, %c0_143, %c0_144] : memref<3x8x8xf32, #tpu.memory_space<vmem>>, vector<3x8x8xf32>
    tpu.vector_store %arg35[%c0_142, %c0_143, %c0_144], %317 {strides = array<i32>} : memref<3x8x8xf32, #tpu.memory_space<vmem>>, vector<3x8x8xf32>,
    %319 = vector.shape_cast %316 : vector<24x8xf32> to vector<3x8x8xf32>
    %c0_145 = arith.constant 0 : index
    %c0_146 = arith.constant 0 : index
    %c0_147 = arith.constant 0 : index
    %320 = vector.load %arg36[%c0_145, %c0_146, %c0_147] : memref<3x8x8xf32, #tpu.memory_space<vmem>>, vector<3x8x8xf32>
    tpu.vector_store %arg36[%c0_145, %c0_146, %c0_147], %319 {strides = array<i32>} : memref<3x8x8xf32, #tpu.memory_space<vmem>>, vector<3x8x8xf32>,
    return
  }
}

</mosaic_0001>

<bundles_post_ra>
// kernel: tpu_custom_call.1
= control target key start
LH: loop header
LB: loop body
LE: loop exit
PB: predicated region body
PF: predicated region fallthrough
CT: control target
= control target key end

     0   :  { %s3735_s6 = smov 1   ;;  %s3736_s10 = smov 2   ;;  %s4622_s0 = inlined_call_operand.smem [shape: u32[37], index: -1, kind: input, shape index: {}] }
   0x1   :  { %s3789_s5 = sld [smem:[%s4622_s0]]   ;;  %s3737_s14 = smov 3  }
   0x2   :  { %s3794_s9 = sld [smem:[%s4622_s0 + %s3735_s6]]   ;;  %s3738_s18 = smov 4  }
   0x3   :  { %s3799_s13 = sld [smem:[%s4622_s0 + %s3736_s10]]   ;;  %s3739_s22 = smov 5  }
   0x4   :  { %s3804_s17 = sld [smem:[%s4622_s0 + %s3737_s14]]   ;;  %s3740_s26 = smov 6  }
   0x5   :  { %s3809_s21 = sld [smem:[%s4622_s0 + %s3738_s18]]   ;;  %s3741_s30 = smov 7  }
   0x6   :  { %s3814_s25 = sld [smem:[%s4622_s0 + %s3739_s22]]   ;;  %s3742_s4 = smov 8  }
   0x7   :  { %s3819_s29 = sld [smem:[%s4622_s0 + %s3740_s26]]   ;;  %s3743_s10 = smov 9  }
   0x8   :  { %4626 = sst [smem:[#allocation8_spill]] %s3794_s9  ;;  %s3744_s15 = smov 10  }
   0x9   :  { %4627 = sst [smem:[#allocation9_spill]] %s3799_s13  ;;  %s3745_s20 = smov 11  }
   0xa   :  { %s3824_s3 = sld [smem:[%s4622_s0 + %s3741_s30]]   ;;  %s3746_s26 = smov 12  }
   0xb   :  { %s3829_s8 = sld [smem:[%s4622_s0 + %s3742_s4]]   ;;  %s3747_s1 = smov 13  }
   0xc   :  { %s3834_s14 = sld [smem:[%s4622_s0 + %s3743_s10]]   ;;  %s3748_s7 = smov 14  }
   0xd   :  { %s3839_s19 = sld [smem:[%s4622_s0 + %s3744_s15]]   ;;  %s3749_s15 = smov 15  }
   0xe   :  { %s3844_s24 = sld [smem:[%s4622_s0 + %s3745_s20]]   ;;  %s3750_s22 = smov 16  }
   0xf   :  { %s3849_s30 = sld [smem:[%s4622_s0 + %s3746_s26]]   ;;  %s3751_s28 = smov 17  }
  0x10   :  { %s3854_s6 = sld [smem:[%s4622_s0 + %s3747_s1]]  }
  0x11   :  { %s3859_s12 = sld [smem:[%s4622_s0 + %s3748_s7]]   ;;  %s3752_s7 = smov 18  }
  0x12   :  { %s3864_s20 = sld [smem:[%s4622_s0 + %s3749_s15]]   ;;  %s3753_s15 = smov 19  }
  0x13   :  { %s3869_s27 = sld [smem:[%s4622_s0 + %s3750_s22]]   ;;  %s3754_s22 = smov 20  }
  0x14   :  { %s3874_s4 = sld [smem:[%s4622_s0 + %s3751_s28]]   ;;  %s3755_s28 = smov 21  }
  0x15   :  { %s3879_s13 = sld [smem:[%s4622_s0 + %s3752_s7]]   ;;  %s3756_s7 = smov 22  }
  0x16   :  { %s3884_s9 = sld [smem:[%s4622_s0 + %s3753_s15]]   ;;  %s3757_s15 = smov 23  }
  0x19   :  { %4628 = sst [smem:[#allocation10_spill]] %s3869_s27 }
  0x1a   :  { %4629 = sst [smem:[#allocation11_spill]] %s3874_s4 }
  0x1b   :  { %4630 = sst [smem:[#allocation12_spill]] %s3879_s13 }
  0x1c   :  { %4631 = sst [smem:[#allocation13_spill]] %s3884_s9 }
  0x1d   :  { %s3889_s27 = sld [smem:[%s4622_s0 + %s3754_s22]]   ;;  %s3758_s22 = smov 24  }
  0x1e   :  { %s3894_s4 = sld [smem:[%s4622_s0 + %s3755_s28]]   ;;  %s3759_s28 = smov 25  }
  0x1f   :  { %s3899_s13 = sld [smem:[%s4622_s0 + %s3756_s7]]   ;;  %s3760_s7 = smov 26  }
  0x20   :  { %s3904_s9 = sld [smem:[%s4622_s0 + %s3757_s15]]   ;;  %s3761_s15 = smov 27  }
  0x23   :  { %4632 = sst [smem:[#allocation14_spill]] %s3889_s27 }
  0x24   :  { %4633 = sst [smem:[#allocation15_spill]] %s3894_s4 }
  0x25   :  { %4634 = sst [smem:[#allocation16_spill]] %s3899_s13 }
  0x26   :  { %4635 = sst [smem:[#allocation17_spill]] %s3904_s9 }
  0x27   :  { %s3909_s27 = sld [smem:[%s4622_s0 + %s3758_s22]]   ;;  %s3762_s22 = smov 28  }
  0x28   :  { %s3914_s4 = sld [smem:[%s4622_s0 + %s3759_s28]]   ;;  %s3763_s28 = smov 29  }
  0x29   :  { %s3919_s13 = sld [smem:[%s4622_s0 + %s3760_s7]]   ;;  %s3764_s7 = smov 30  }
  0x2a   :  { %s3924_s9 = sld [smem:[%s4622_s0 + %s3761_s15]]   ;;  %s3765_s15 = smov 31  }
  0x2d   :  { %4636 = sst [smem:[#allocation18_spill]] %s3909_s27 }
  0x2e   :  { %4637 = sst [smem:[#allocation19_spill]] %s3914_s4 }
  0x2f   :  { %4638 = sst [smem:[#allocation20_spill]] %s3919_s13 }
  0x30   :  { %4639 = sst [smem:[#allocation21_spill]] %s3924_s9 }
  0x31   :  { %s3929_s27 = sld [smem:[%s4622_s0 + %s3762_s22]]   ;;  %s3766_s22 = smov 32  }
  0x32   :  { %s3934_s4 = sld [smem:[%s4622_s0 + %s3763_s28]]   ;;  %s3767_s28 = smov 33  }
  0x33   :  { %s3939_s13 = sld [smem:[%s4622_s0 + %s3764_s7]]   ;;  %s3768_s7 = smov 34  }
  0x34   :  { %s3944_s9 = sld [smem:[%s4622_s0 + %s3765_s15]]   ;;  %s3769_s15 = smov 35  }
  0x37   :  { %4640 = sst [smem:[#allocation22_spill]] %s3929_s27 }
  0x38   :  { %4641 = sst [smem:[#allocation23_spill]] %s3934_s4 }
  0x39   :  { %4642 = sst [smem:[#allocation24_spill]] %s3939_s13 }
  0x3a   :  { %4643 = sst [smem:[#allocation25_spill]] %s3944_s9 }
  0x3b   :  { %s3949_s27 = sld [smem:[%s4622_s0 + %s3766_s22]]   ;;  %s3770_s22 = smov 36  }
  0x3c   :  { %s3954_s4 = sld [smem:[%s4622_s0 + %s3767_s28]]  }
  0x3d   :  { %s3959_s13 = sld [smem:[%s4622_s0 + %s3768_s7]]  }
  0x3e   :  { %s3964_s9 = sld [smem:[%s4622_s0 + %s3769_s15]]  }
  0x41   :  { %4644 = sst [smem:[#allocation26_spill]] %s3949_s27 }
  0x42   :  { %s3969_s27 = sld [smem:[%s4622_s0 + %s3770_s22]]  }
  0x43   :  { %79 = vsyncpa [#allocation3], 0  ;;  %v3972_v0 = vld [vmem:[%s3789_s5] sm:$0xff]  ;;  %v3975_v1 = vld [vmem:[%s3789_s5 + $0x8] sm:$0xff]  ;;  %vm211_vm0 = vcmask 1046528   ;;  %v3771_v4 = vmov 0.0  }
  0x44   :  { %v237_v2 = vrot.slane %v3972_v0, 2  ;;  %v213_v3 = vrot.slane %v3972_v0, 1  ;;  %v3980_v5 = vrot.slane %v3771_v4, 1  ;;  %v215_v6 = vrot.slane %v3975_v1, 1  ;;  %v158_v7 = vld [vmem:[%s3804_s17] sm:$0xff]  ;;  %3275 = vmatprep.subr.mxu1 %v3771_v4  ;;  %v159_v8 = vld [vmem:[%s3804_s17 + $0x8] sm:$0xff] }
  0x45   :  { %s3772_s0 = smov 16   ;;  %s3773_s28 = smov 8  }
  0x46   :  { %240 = vrot.lane.b32.xlu1 %v237_v2, %s3772_s0  ;;  %221 = vrot.lane.b32.xlu0 %v213_v3, %s3773_s28 }
  0x47   :  { %80 = vsyncpa [#allocation5], 0  ;;  %v216_v9 = vsel %vm211_vm0, %v3980_v5, %v215_v6  ;;  %v214_v10 = vsel %vm211_vm0, %v3980_v5, %v213_v3  ;;  %v3774_v11 = vmov 0.0|0.0   ;;  %v3527_v12 = vpack.c.bf16 %v159_v8, %v158_v7  ;;  %v3994_v13 = vld [vmem:[%s3789_s5 + $0x10] sm:$0xff]  ;;  %v169_v49 = vld [vmem:[%s3824_s3] sm:$0xff]  ;;  %s3776_s5 = smov 32  }
  0x48   :  { %3526 = vmatprep.subr.bf16.mxu0 %v3774_v11  ;;  %vm3775_vm1 = vmmov 0   ;;  %v238_v14 = vrot.slane %v3975_v1, 2  ;;  %v160_v15 = vld [vmem:[%s3804_s17 + $0x10] sm:$0xff]  ;;  %v217_v16 = vrot.slane %v3994_v13, 1  ;;  %v239_v18 = vrot.slane %v3994_v13, 2  ;;  %v162_v50 = vld [vmem:[%s3814_s25] sm:$0xff]  ;;  %3276 = vmatpush3.msra.mxu1 %v169_v49 }
  0x49   :  { %3266 = vmatprep.mubr.msk.f32.mxu0 %vm3775_vm1, %v3771_v4  ;;  %3277 = vmatprep.mubr.msk.f32.mxu1 %vm3775_vm1, %v3771_v4  ;;  %vm249_vm2 = vcmask 64512   ;;  %vm256_vm3 = vcmask 130048   ;;  %vm269_vm4 = vcmask 1041408   ;;  %vm285_vm5 = vcmask 195584   ;;  %v163_v51 = vld [vmem:[%s3814_s25 + $0x8] sm:$0xff]  ;;  %v164_v53 = vld [vmem:[%s3814_s25 + $0x10] sm:$0xff] }
  0x4a   :  { %3528 = vmatpush3.bf16.msra.mxu0 %v3527_v12  ;;  %223 = vrot.lane.b32.xlu1 %v216_v9, %s3773_s28  ;;  %v218_v17 = vsel %vm211_vm0, %v3980_v5, %v217_v16  ;;  %v3530_v52 = vpack.c.bf16 %v163_v51, %v162_v50  ;;  %v165_v54 = vld [vmem:[%s3814_s25 + $0x18] sm:$0xff]  ;;  %v166_v56 = vld [vmem:[%s3814_s25 + $0x20] sm:$0xff]  ;;  %v167_v57 = vld [vmem:[%s3814_s25 + $0x28] sm:$0xff]  ;;  %vm512_vm6 = vcmask 261120   ;;  %vm540_vm7 = vcmask 392192   ;;  %s4645_s17 = sld [smem:[#allocation11_spill]] }
  0x4b   :  { %219 = vrot.lane.b32.xlu0 %v214_v10, %s3773_s28  ;;  %3264 = vmatprep.subr.mxu0 %v3771_v4  ;;  %v3533_v55 = vpack.c.bf16 %v165_v54, %v164_v53  ;;  %v3082_v58 = vld [vmem:[%s3809_s21] ss:$0 sm:$0xff]  ;;  %v3536_v59 = vpack.c.bf16 %v167_v57, %v166_v56  ;;  %v183_v56 = vld [vmem:[%s3854_s6 + $0x8] sm:$0xff]  ;;  %vm639_vm8 = vcmask 1045504   ;;  %vm695_vm9 = vcmask 1043456   ;;  %s4646_s21 = sld [smem:[#allocation10_spill]] }
  0x4c   :  { %3278 = vmatmul.mubr.msk.f32.vlgmr.msra.gmra.mrb[0].mxu1 %vm249_vm2, %v3972_v0  ;;  %3529 = vmatprep.subr.bf16.mxu1 %v3774_v11  ;;  %s4647_s25 = sld [smem:[#allocation13_spill]]  ;;  %s4649_s3 = sld [smem:[#allocation15_spill]] }
  0x4d   :  { %3531 = vmatpush3.bf16.msra.mxu1 %v3530_v52  ;;  %3280 = vmatprep.mubr.msk.f32.mxu1 %vm3775_vm1, %v3771_v4  ;;  %s4657_s1 = sld [smem:[#allocation18_spill]]  ;;  %s4658_s2 = sld [smem:[#allocation19_spill]] }
  0x4e   :  { %3265 = vmatpush3.msra.mxu0 %v160_v15  ;;  %242 = vrot.lane.b32.xlu1 %v238_v14, %s3772_s0  ;;  %s4659_s7 = sld [smem:[#allocation20_spill]]  ;;  %s4660_s10 = sld [smem:[#allocation25_spill]] }
  0x4f   :  { %225 = vrot.lane.b32.xlu0 %v215_v6, %s3773_s28  ;;  %3538 = vmatprep.subr.bf16.mxu0 %v3774_v11  ;;  %s4661_s11 = sld [smem:[#allocation26_spill]]  ;;  %s4662_s15 = sld [smem:[#allocation21_spill]] }
  0x50   :  { %3532 = vmatprep.subr.bf16.mxu1 %v3774_v11  ;;  %3281 = vmatmul.mubr.msk.f32.gmra.mrb[2].mxu1 %vm249_vm2, %v3975_v1  ;;  %s4663_s16 = sld [smem:[#allocation22_spill]] }
  0x51   :  { %3283 = vmatprep.mubr.msk.f32.mxu1 %vm3775_vm1, %v3771_v4  ;;  %3534 = vmatpush3.bf16.msra.mxu1 %v3533_v55  ;;  %v182_v55 = vld [vmem:[%s3854_s6] sm:$0xff]  ;;  %s4654_s6 = sld [smem:[#allocation17_spill]] }
  0x52   :  { %229 = vrot.lane.b32.xlu1 %v217_v16, %s3773_s28  ;;  %3535 = vmatprep.subr.bf16.mxu1 %v3774_v11  ;;  %v3548_v57 = vpack.c.bf16 %v183_v56, %v182_v55 }
  0x53   :  { %227 = vrot.lane.b32.xlu0 %v218_v17, %s3773_s28 }
  0x54   :  { %3284 = vmatmul.mubr.msk.f32.gmra.mrb[4].mxu1 %vm249_vm2, %v3994_v13 }
  0x55   :  { %3298 = vmatprep.mubr.msk.f32.mxu1 %vm3775_vm1, %v3771_v4  ;;  %3537 = vmatpush3.bf16.msra.mxu1 %v3536_v59  ;;  %v172_v59 = vld [vmem:[%s3834_s14 + $0x8] sm:$0xff] }
  0x56   :  { %3547 = vmatprep.subr.bf16.mxu1 %v3774_v11 }
  0x57   :  { %244 = vrot.lane.b32.xlu0 %v239_v18, %s3772_s0 }
  0xb8   :  { %v241_v19 = vpop.permute.xlu1 %240  ;;  %v222_v20 = vpop.permute.xlu0 %221 }
  0xb9   :  { %v251_v21 = vsel %vm249_vm2, %v3972_v0, %v222_v20 }
  0xba   :  { %v258_v22 = vsel %vm256_vm3, %v251_v21, %v241_v19 }
  0xbb   :  { %v271_v28 = vrot.slane %v258_v22, 6 }
  0xbc   :  { %v224_v23 = vpop.permute.xlu1 %223 }
  0xbd   :  { %v220_v24 = vpop.permute.xlu0 %219  ;;  %v252_v26 = vsel %vm249_vm2, 0.0, %v224_v23 }
  0xbe   :  { %v250_v25 = vsel %vm249_vm2, 0.0, %v220_v24 }
  0xbf   :  { %v257_v27 = vsel %vm256_vm3, %v250_v25, %v241_v19 }
  0xc0   :  { %v270_v29 = vrot.slane %v257_v27, 6  ;;  %v243_v30 = vpop.permute.xlu1 %242 }
  0xc1   :  { %v226_v31 = vpop.permute.xlu0 %225  ;;  %v259_v32 = vsel %vm256_vm3, %v252_v26, %v243_v30 }
  0xc2   :  { %v253_v33 = vsel %vm249_vm2, %v3975_v1, %v226_v31  ;;  %v272_v34 = vsel %vm269_vm4, %v270_v29, %v271_v28  ;;  %v273_v35 = vrot.slane %v259_v32, 6 }
  0xc3   :  { %v260_v36 = vsel %vm256_vm3, %v253_v33, %v243_v30  ;;  %3267 = vmatmul.mubr.msk.f32.vlgmr.msra.gmra.mrb[0].mxu0 %vm285_vm5, %v272_v34 }
  0xc4   :  { %v274_v37 = vrot.slane %v260_v36, 6  ;;  %3269 = vmatprep.mubr.msk.f32.mxu0 %vm3775_vm1, %v3771_v4  ;;  %v230_v39 = vpop.permute.xlu1 %229 }
  0xc5   :  { %v228_v38 = vpop.permute.xlu0 %227  ;;  %v255_v41 = vsel %vm249_vm2, %v3994_v13, %v230_v39 }
  0xc6   :  { %v275_v40 = vsel %vm269_vm4, %v273_v35, %v274_v37  ;;  %v254_v42 = vsel %vm249_vm2, 0.0, %v228_v38 }
  0xc7   :  { %3270 = vmatmul.mubr.msk.f32.gmra.mrb[2].mxu0 %vm285_vm5, %v275_v40 }
  0xc8   :  { %3272 = vmatprep.mubr.msk.f32.mxu0 %vm3775_vm1, %v3771_v4 }
  0xc9   :  { %v245_v43 = vpop.permute.xlu0 %244 }
  0xca   :  { %v261_v44 = vsel %vm256_vm3, %v254_v42, %v245_v43  ;;  %v262_v45 = vsel %vm256_vm3, %v255_v41, %v245_v43 }
  0xcb   :  { %v276_v46 = vrot.slane %v261_v44, 6  ;;  %v277_v47 = vrot.slane %v262_v45, 6 }
  0xcd   :  { %v278_v48 = vsel %vm269_vm4, %v276_v46, %v277_v47 }
  0xce   :  { %3273 = vmatmul.mubr.msk.f32.gmra.mrb[4].mxu0 %vm285_vm5, %v278_v48 }
  0xcf   :  { %3319 = vmatprep.mubr.msk.f32.mxu0 %vm3775_vm1, %v3771_v4 }
 0x11f   :  { %v4081_v20 = vpop.f32.mrb[0].mxu1 }
 0x120   :  { %v3279_v21 = vpop.f32.mrb[1].mxu1 }
 0x123   :  { %v4083_v22 = vpop.f32.mrb[2].mxu1 }
 0x124   :  { %v3282_v23 = vpop.f32.mrb[3].mxu1 }
 0x127   :  { %v4085_v24 = vpop.f32.mrb[4].mxu1 }
 0x128   :  { %v3285_v25 = vpop.f32.mrb[5].mxu1 }
 0x196   :  { %v358_v60 = vpop.f32.mrb[0].mxu0 }
 0x197   :  { %v359_v61 = vadd.f32 %v3082_v58, %v358_v60  ;;  %v3268_v62 = vpop.f32.mrb[1].mxu0 }
 0x198   :  { %v174_v62 = vld [vmem:[%s3834_s14 + $0x18] sm:$0xff] }
 0x199   :  { %v372_v63 = vmax.f32 %v359_v61, 0.0  ;;  %v173_v61 = vld [vmem:[%s3834_s14 + $0x10] sm:$0xff] }
 0x19a   :  { %v363_v0 = vpop.f32.mrb[2].mxu0 }
 0x19b   :  { %v364_v1 = vadd.f32 %v3082_v58, %v363_v0  ;;  %v3271_v2 = vpop.f32.mrb[3].mxu0  ;;  %v494_v3 = vrot.slane %v372_v63, 2  ;;  %v470_v6 = vrot.slane %v372_v63, 1  ;;  %v3542_v0 = vpack.c.bf16 %v174_v62, %v173_v61 }
 0x19d   :  { %v373_v7 = vmax.f32 %v364_v1, 0.0  ;;  %497 = vrot.lane.b32.xlu1 %v494_v3, %s3776_s5  ;;  %478 = vrot.lane.b32.xlu0 %v470_v6, %s3772_s0  ;;  %v471_v9 = vsel %vm211_vm0, %v3980_v5, %v470_v6  ;;  %v3086_v1 = vld [vmem:[%s3829_s8] ss:$0 sm:$0xff]  ;;  %s4650_s8 = sld [smem:[#allocation12_spill]] }
 0x19f   :  { %v495_v8 = vrot.slane %v373_v7, 2  ;;  %v472_v10 = vrot.slane %v373_v7, 1 }
 0x1a1   :  { %476 = vrot.lane.b32.xlu1 %v471_v9, %s3772_s0  ;;  %499 = vrot.lane.b32.xlu0 %v495_v8, %s3776_s5  ;;  %v368_v12 = vpop.f32.mrb[4].mxu0  ;;  %v473_v16 = vsel %vm211_vm0, %v3980_v5, %v472_v10  ;;  %v176_v8 = vld [vmem:[%s3834_s14 + $0x28] sm:$0xff] }
 0x1a2   :  { %v369_v13 = vadd.f32 %v3082_v58, %v368_v12  ;;  %v3274_v14 = vpop.f32.mrb[5].mxu0  ;;  %v171_v58 = vld [vmem:[%s3834_s14] sm:$0xff] }
 0x1a3   :  { %v3539_v60 = vpack.c.bf16 %v172_v59, %v171_v58 }
 0x1a4   :  { %v374_v15 = vmax.f32 %v369_v13, 0.0 }
 0x1a5   :  { %482 = vrot.lane.b32.xlu1 %v472_v10, %s3772_s0  ;;  %480 = vrot.lane.b32.xlu0 %v473_v16, %s3772_s0  ;;  %v454_v10 = vadd.f32 %v3086_v1, %v4081_v20  ;;  %v4131_v20 = vrot.slane %v3771_v4, 2 }
 0x1a6   :  { %v474_v17 = vrot.slane %v374_v15, 1  ;;  %v496_v19 = vrot.slane %v374_v15, 2  ;;  %3540 = vmatpush3.bf16.msra.mxu0 %v3539_v60 }
 0x1a7   :  { %3541 = vmatprep.subr.bf16.mxu0 %v3774_v11 }
 0x1a8   :  { %v475_v18 = vsel %vm211_vm0, %v3980_v5, %v474_v17 }
 0x1a9   :  { %486 = vrot.lane.b32.xlu0 %v474_v17, %s3772_s0  ;;  %484 = vrot.lane.b32.xlu1 %v475_v18, %s3772_s0  ;;  %v459_v17 = vadd.f32 %v3086_v1, %v4083_v22 }
 0x1aa   :  { %3543 = vmatpush3.bf16.msra.mxu0 %v3542_v0 }
 0x1ab   :  { %3544 = vmatprep.subr.bf16.mxu0 %v3774_v11 }
 0x1ad   :  { %501 = vrot.lane.b32.xlu1 %v496_v19, %s3776_s5 }
 0x20f   :  { %v498_v26 = vpop.permute.xlu1 %497  ;;  %v479_v27 = vpop.permute.xlu0 %478 }
 0x210   :  { %v507_v5 = vsel %vm256_vm3, %v372_v63, %v479_v27  ;;  %v3090_v63 = vld [vmem:[%s3819_s29] ss:$0 sm:$0xff]  ;;  %s4648_s29 = sld [smem:[#allocation14_spill]] }
 0x211   :  { %v514_v28 = vsel %vm512_vm6, %v507_v5, %v498_v26 }
 0x212   :  { %v526_v33 = vrot.slane %v514_v28, 6 }
 0x213   :  { %v477_v29 = vpop.permute.xlu1 %476  ;;  %v500_v30 = vpop.permute.xlu0 %499 }
 0x214   :  { %v506_v31 = vsel %vm256_vm3, 0.0, %v477_v29  ;;  %v464_v29 = vadd.f32 %v3086_v1, %v4085_v24 }
 0x215   :  { %v513_v32 = vsel %vm512_vm6, %v506_v31, %v498_v26 }
 0x216   :  { %v525_v34 = vrot.slane %v513_v32, 6 }
 0x217   :  { %v483_v35 = vpop.permute.xlu1 %482  ;;  %v481_v36 = vpop.permute.xlu0 %480 }
 0x218   :  { %v509_v37 = vsel %vm256_vm3, %v373_v7, %v483_v35  ;;  %v508_v38 = vsel %vm256_vm3, 0.0, %v481_v36  ;;  %v527_v39 = vsel %vm269_vm4, %v525_v34, %v526_v33  ;;  %v175_v7 = vld [vmem:[%s3834_s14 + $0x20] sm:$0xff]  ;;  %s4651_s14 = sld [smem:[#allocation8_spill]] }
 0x219   :  { %v516_v40 = vsel %vm512_vm6, %v509_v37, %v500_v30  ;;  %v515_v41 = vsel %vm512_vm6, %v508_v38, %v500_v30  ;;  %3299 = vmatmul.mubr.msk.f32.vlgmr.msra.gmra.mrb[6].mxu1 %vm540_vm7, %v527_v39  ;;  %v3545_v9 = vpack.c.bf16 %v176_v8, %v175_v7 }
 0x21a   :  { %v529_v42 = vrot.slane %v516_v40, 6  ;;  %v528_v43 = vrot.slane %v515_v41, 6  ;;  %3301 = vmatprep.mubr.msk.f32.mxu1 %vm3775_vm1, %v3771_v4  ;;  %3549 = vmatpush3.bf16.msra.mxu1 %v3548_v57 }
 0x21b   :  { %v485_v44 = vpop.permute.xlu1 %484  ;;  %v487_v45 = vpop.permute.xlu0 %486  ;;  %3356 = vmatprep.subr.mxu1 %v3771_v4  ;;  %3546 = vmatpush3.bf16.msra.mxu0 %v3545_v9 }
 0x21c   :  { %v530_v46 = vsel %vm269_vm4, %v528_v43, %v529_v42  ;;  %v510_v47 = vsel %vm256_vm3, 0.0, %v485_v44  ;;  %v511_v48 = vsel %vm256_vm3, %v374_v15, %v487_v45  ;;  %3550 = vmatprep.subr.bf16.mxu0 %v3774_v11 }
 0x21d   :  { %3302 = vmatmul.mubr.msk.f32.gmra.mrb[8].mxu1 %vm540_vm7, %v530_v46 }
 0x21e   :  { %3304 = vmatprep.mubr.msk.f32.mxu1 %vm3775_vm1, %v3771_v4 }
 0x21f   :  { %v502_v49 = vpop.permute.xlu1 %501 }
 0x220   :  { %v517_v50 = vsel %vm512_vm6, %v510_v47, %v502_v49  ;;  %v518_v51 = vsel %vm512_vm6, %v511_v48, %v502_v49 }
 0x221   :  { %v531_v52 = vrot.slane %v517_v50, 6  ;;  %v532_v53 = vrot.slane %v518_v51, 6 }
 0x223   :  { %v533_v54 = vsel %vm269_vm4, %v531_v52, %v532_v53 }
 0x224   :  { %3305 = vmatmul.mubr.msk.f32.gmra.mrb[10].mxu1 %vm540_vm7, %v533_v54 }
 0x225   :  { %3332 = vmatprep.mubr.msk.f32.mxu1 %vm3775_vm1, %v3771_v4 }
 0x2ec   :  { %v613_v2 = vpop.f32.mrb[6].mxu1 }
 0x2ed   :  { %v614_v3 = vadd.f32 %v3090_v63, %v613_v2  ;;  %v3300_v6 = vpop.f32.mrb[7].mxu1 }
 0x2ef   :  { %v627_v12 = vmax.f32 %v614_v3, 0.0 }
 0x2f0   :  { %v618_v13 = vpop.f32.mrb[8].mxu1 }
 0x2f1   :  { %v630_v14 = vadd.f32 %v627_v12, %v454_v10  ;;  %v619_v15 = vadd.f32 %v3090_v63, %v618_v13  ;;  %v3303_v16 = vpop.f32.mrb[9].mxu1  ;;  %v178_v13 = vld [vmem:[%s3844_s24] sm:$0xff] }
 0x2f2   :  { %v3094_v16 = vld [vmem:[%s3839_s19] ss:$0 sm:$0xff]  ;;  %s3777_s19 = smov 120  }
 0x2f3   :  { %v633_v18 = vmax.f32 %v630_v14, 0.0  ;;  %v628_v19 = vmax.f32 %v619_v15, 0.0  ;;  %v179_v14 = vld [vmem:[%s3844_s24 + $0x8] sm:$0xff] }
 0x2f4   :  { %v3551_v15 = vpack.c.bf16 %v179_v14, %v178_v13 }
 0x2f5   :  { %v631_v21 = vadd.f32 %v628_v19, %v459_v17  ;;  %3333 = vmatmul.mubr.msk.f32.vlgmr.msra.gmra.mrb[12].mxu1 %vm256_vm3, %v633_v18  ;;  %v665_v23 = vrot.slane %v633_v18, 4  ;;  %v641_v25 = vrot.slane %v633_v18, 2 }
 0x2f6   :  { %3335 = vmatprep.mubr.msk.f32.mxu1 %vm3775_vm1, %v3771_v4 }
 0x2f7   :  { %v634_v26 = vmax.f32 %v631_v21, 0.0  ;;  %668 = vrot.lane.b32.xlu0 %v665_v23, %s3776_s5  ;;  %649 = vrot.lane.b32.xlu1 %v641_v25, %s3772_s0  ;;  %v623_v27 = vpop.f32.mrb[10].mxu1  ;;  %v642_v31 = vsel %vm639_vm8, %v4131_v20, %v641_v25  ;;  %v180_v21 = vld [vmem:[%s3844_s24 + $0x10] sm:$0xff]  ;;  %s4652_s24 = sld [smem:[#allocation9_spill]] }
 0x2f8   :  { %v624_v22 = vadd.f32 %v3090_v63, %v623_v27  ;;  %v3306_v5 = vpop.f32.mrb[11].mxu1 }
 0x2f9   :  { %3336 = vmatmul.mubr.msk.f32.gmra.mrb[14].mxu1 %vm256_vm3, %v634_v26  ;;  %v666_v28 = vrot.slane %v634_v26, 4  ;;  %v643_v32 = vrot.slane %v634_v26, 2 }
 0x2fa   :  { %v629_v30 = vmax.f32 %v624_v22, 0.0  ;;  %3338 = vmatprep.mubr.msk.f32.mxu1 %vm3775_vm1, %v3771_v4 }
 0x2fb   :  { %647 = vrot.lane.b32.xlu0 %v642_v31, %s3772_s0  ;;  %670 = vrot.lane.b32.xlu1 %v666_v28, %s3776_s5  ;;  %v644_v35 = vsel %vm639_vm8, %v4131_v20, %v643_v32 }
 0x2fc   :  { %v632_v33 = vadd.f32 %v629_v30, %v464_v29 }
 0x2fe   :  { %v635_v34 = vmax.f32 %v632_v33, 0.0 }
 0x2ff   :  { %653 = vrot.lane.b32.xlu0 %v643_v32, %s3772_s0  ;;  %651 = vrot.lane.b32.xlu1 %v644_v35, %s3772_s0 }
 0x300   :  { %3339 = vmatmul.mubr.msk.f32.gmra.mrb[16].mxu1 %vm256_vm3, %v635_v34  ;;  %v645_v24 = vrot.slane %v635_v34, 2  ;;  %v667_v37 = vrot.slane %v635_v34, 4 }
 0x301   :  { %3358 = vmatprep.mubr.msk.f32.mxu1 %vm3775_vm1, %v3771_v4 }
 0x302   :  { %v646_v36 = vsel %vm639_vm8, %v4131_v20, %v645_v24 }
 0x303   :  { %657 = vrot.lane.b32.xlu1 %v645_v24, %s3772_s0  ;;  %655 = vrot.lane.b32.xlu0 %v646_v36, %s3772_s0 }
 0x307   :  { %672 = vrot.lane.b32.xlu0 %v667_v37, %s3776_s5 }
 0x369   :  { %v650_v38 = vpop.permute.xlu1 %649  ;;  %v669_v39 = vpop.permute.xlu0 %668 }
 0x36a   :  { %v678_v40 = vsel %vm256_vm3, %v633_v18, %v650_v38 }
 0x36b   :  { %v684_v41 = vsel %vm512_vm6, %v678_v40, %v669_v39 }
 0x36c   :  { %v697_v46 = vrot.slane %v684_v41, 4 }
 0x36d   :  { %v671_v42 = vpop.permute.xlu1 %670  ;;  %v648_v43 = vpop.permute.xlu0 %647 }
 0x36e   :  { %v677_v44 = vsel %vm256_vm3, 0.0, %v648_v43 }
 0x36f   :  { %v683_v45 = vsel %vm512_vm6, %v677_v44, %v669_v39 }
 0x370   :  { %v696_v47 = vrot.slane %v683_v45, 4 }
 0x371   :  { %v652_v48 = vpop.permute.xlu1 %651  ;;  %v654_v49 = vpop.permute.xlu0 %653 }
 0x372   :  { %v698_v50 = vsel %vm695_vm9, %v696_v47, %v697_v46  ;;  %v679_v51 = vsel %vm256_vm3, 0.0, %v652_v48  ;;  %v680_v52 = vsel %vm256_vm3, %v634_v26, %v654_v49 }
 0x373   :  { %v685_v53 = vsel %vm512_vm6, %v679_v51, %v671_v42  ;;  %v686_v54 = vsel %vm512_vm6, %v680_v52, %v671_v42  ;;  %3320 = vmatmul.mubr.msk.f32.vlgmr.msra.gmra.mrb[6].mxu0 %vm540_vm7, %v698_v50 }
 0x374   :  { %v699_v55 = vrot.slane %v685_v53, 4  ;;  %v700_v56 = vrot.slane %v686_v54, 4  ;;  %3322 = vmatprep.mubr.msk.f32.mxu0 %vm3775_vm1, %v3771_v4  ;;  %3552 = vmatpush3.bf16.msra.mxu0 %v3551_v15 }
 0x375   :  { %v656_v57 = vpop.permute.xlu0 %655  ;;  %v658_v58 = vpop.permute.xlu1 %657  ;;  %3345 = vmatprep.subr.mxu0 %v3771_v4 }
 0x376   :  { %v701_v59 = vsel %vm695_vm9, %v699_v55, %v700_v56  ;;  %v682_v60 = vsel %vm256_vm3, %v635_v34, %v658_v58  ;;  %v681_v61 = vsel %vm256_vm3, 0.0, %v656_v57 }
 0x377   :  { %3323 = vmatmul.mubr.msk.f32.gmra.mrb[8].mxu0 %vm540_vm7, %v701_v59 }
 0x378   :  { %3325 = vmatprep.mubr.msk.f32.mxu0 %vm3775_vm1, %v3771_v4  ;;  %3346 = vmatpush3.msra.mxu0 %v180_v21 }
 0x379   :  { %v673_v62 = vpop.permute.xlu0 %672  ;;  %3367 = vmatprep.subr.mxu0 %v3771_v4 }
 0x37a   :  { %v687_v63 = vsel %vm512_vm6, %v681_v61, %v673_v62  ;;  %v688_v0 = vsel %vm512_vm6, %v682_v60, %v673_v62 }
 0x37b   :  { %v702_v1 = vrot.slane %v687_v63, 4  ;;  %v703_v2 = vrot.slane %v688_v0, 4 }
 0x37d   :  { %v704_v3 = vsel %vm695_vm9, %v702_v1, %v703_v2 }
 0x37e   :  { %3326 = vmatmul.mubr.msk.f32.gmra.mrb[10].mxu0 %vm540_vm7, %v704_v3 }
 0x37f   :  { %3347 = vmatprep.mubr.msk.f32.mxu0 %vm3775_vm1, %v3771_v4 }
 0x3c8   :  { %v4179_v6 = vpop.f32.mrb[12].mxu1 }
 0x3c9   :  { %v3334_v7 = vpop.f32.mrb[13].mxu1 }
 0x3ca   :  { %v185_v7 = vld [vmem:[%s3864_s20] sm:$0xff]  ;;  %s4656_s20 = sld [smem:[#allocation24_spill]] }
 0x3cb   :  { %3357 = vmatpush3.msra.mxu1 %v185_v7 }
 0x3cc   :  { %v4181_v8 = vpop.f32.mrb[14].mxu1  ;;  %3378 = vmatprep.subr.mxu1 %v3771_v4 }
 0x3cd   :  { %v3337_v9 = vpop.f32.mrb[15].mxu1 }
 0x3ce   :  { %v3102_v9 = vld [vmem:[%s3849_s30] ss:$0 sm:$0xff]  ;;  %s4653_s30 = sld [smem:[#allocation16_spill]] }
 0x3d3   :  { %v4183_v10 = vpop.f32.mrb[16].mxu1 }
 0x3d4   :  { %v3340_v12 = vpop.f32.mrb[17].mxu1 }
 0x3d5   :  { %v3098_v12 = vld [vmem:[%s3859_s12] ss:$0 sm:$0xff]  ;;  %s4655_s12 = sld [smem:[#allocation23_spill]] }
 0x446   :  { %v783_v17 = vpop.f32.mrb[6].mxu0 }
 0x447   :  { %v784_v18 = vadd.f32 %v3094_v16, %v783_v17  ;;  %v3321_v19 = vpop.f32.mrb[7].mxu0 }
 0x449   :  { %v797_v23 = vmax.f32 %v784_v18, 0.0 }
 0x44a   :  { %v788_v25 = vpop.f32.mrb[8].mxu0 }
 0x44b   :  { %v789_v26 = vadd.f32 %v3094_v16, %v788_v25  ;;  %v3324_v27 = vpop.f32.mrb[9].mxu0  ;;  %v919_v22 = vrot.slane %v797_v23, 4  ;;  %v895_v5 = vrot.slane %v797_v23, 2  ;;  %v884_v25 = vadd.f32 %v3098_v12, %v4181_v8 }
 0x44d   :  { %v798_v28 = vmax.f32 %v789_v26, 0.0  ;;  %922 = vrot.lane.b32.xlu1 %v919_v22, %s3772_s0  ;;  %903 = vrot.lane.b32.xlu0 %v895_v5, %s3773_s28  ;;  %v896_v30 = vsel %vm639_vm8, %v4131_v20, %v895_v5 }
 0x44f   :  { %v920_v29 = vrot.slane %v798_v28, 4  ;;  %v897_v31 = vrot.slane %v798_v28, 2 }
 0x451   :  { %901 = vrot.lane.b32.xlu1 %v896_v30, %s3773_s28  ;;  %924 = vrot.lane.b32.xlu0 %v920_v29, %s3772_s0  ;;  %v793_v32 = vpop.f32.mrb[10].mxu0  ;;  %v898_v24 = vsel %vm639_vm8, %v4131_v20, %v897_v31  ;;  %v889_v30 = vadd.f32 %v3098_v12, %v4183_v10 }
 0x452   :  { %v794_v33 = vadd.f32 %v3094_v16, %v793_v32  ;;  %v3327_v34 = vpop.f32.mrb[11].mxu0  ;;  %v879_v16 = vadd.f32 %v3098_v12, %v4179_v6 }
 0x453   :  { %v3106_v34 = vld [vmem:[%s4646_s21] ss:$0 sm:$0xff] }
 0x454   :  { %v799_v35 = vmax.f32 %v794_v33, 0.0  ;;  %v187_v33 = vld [vmem:[%s4645_s17] sm:$0xff] }
 0x455   :  { %907 = vrot.lane.b32.xlu1 %v897_v31, %s3773_s28  ;;  %905 = vrot.lane.b32.xlu0 %v898_v24, %s3773_s28 }
 0x456   :  { %v899_v36 = vrot.slane %v799_v35, 2  ;;  %v921_v38 = vrot.slane %v799_v35, 4 }
 0x458   :  { %v900_v37 = vsel %vm639_vm8, %v4131_v20, %v899_v36 }
 0x459   :  { %911 = vrot.lane.b32.xlu0 %v899_v36, %s3773_s28  ;;  %909 = vrot.lane.b32.xlu1 %v900_v37, %s3773_s28 }
 0x45d   :  { %926 = vrot.lane.b32.xlu1 %v921_v38, %s3772_s0 }
 0x4bf   :  { %v923_v39 = vpop.permute.xlu1 %922  ;;  %v904_v40 = vpop.permute.xlu0 %903 }
 0x4c0   :  { %v932_v41 = vsel %vm249_vm2, %v797_v23, %v904_v40 }
 0x4c1   :  { %v938_v42 = vsel %vm256_vm3, %v932_v41, %v923_v39 }
 0x4c2   :  { %v950_v20 = vrot.slane %v938_v42, 4 }
 0x4c3   :  { %v902_v43 = vpop.permute.xlu1 %901  ;;  %v925_v44 = vpop.permute.xlu0 %924 }
 0x4c4   :  { %v931_v45 = vsel %vm249_vm2, 0.0, %v902_v43 }
 0x4c5   :  { %v937_v46 = vsel %vm256_vm3, %v931_v45, %v923_v39 }
 0x4c6   :  { %v949_v47 = vrot.slane %v937_v46, 4 }
 0x4c7   :  { %v908_v48 = vpop.permute.xlu1 %907  ;;  %v906_v49 = vpop.permute.xlu0 %905 }
 0x4c8   :  { %v951_v50 = vsel %vm695_vm9, %v949_v47, %v950_v20  ;;  %v934_v51 = vsel %vm249_vm2, %v798_v28, %v908_v48  ;;  %v933_v52 = vsel %vm249_vm2, 0.0, %v906_v49  ;;  %v189_v47 = vld [vmem:[%s4647_s25] sm:$0xff]  ;;  %v1359_v48 = vlaneseq }
 0x4c9   :  { %v940_v53 = vsel %vm256_vm3, %v934_v51, %v925_v44  ;;  %v939_v54 = vsel %vm256_vm3, %v933_v52, %v925_v44  ;;  %3348 = vmatmul.mubr.msk.f32.vlgmr.msra.gmra.mrb[12].mxu0 %vm285_vm5, %v951_v50  ;;  %v190_v50 = vld [vmem:[%s4648_s29] sm:$0x3] }
 0x4ca   :  { %v953_v55 = vrot.slane %v940_v53, 4  ;;  %v952_v56 = vrot.slane %v939_v54, 4  ;;  %3350 = vmatprep.mubr.msk.f32.mxu0 %vm3775_vm1, %v3771_v4  ;;  %3368 = vmatpush3.msra.mxu0 %v187_v33  ;;  %v1360_v49 = vshrl.u32 %v1359_v48, 7  ;;  %v191_v51 = vld [vmem:[%s4649_s3] sm:$0x3] }
 0x4cb   :  { %v910_v57 = vpop.permute.xlu1 %909  ;;  %v912_v58 = vpop.permute.xlu0 %911  ;;  %3553 = vmatprep.subr.bf16.mxu0 %v3774_v11 }
 0x4cc   :  { %v954_v59 = vsel %vm695_vm9, %v952_v56, %v953_v55  ;;  %v935_v60 = vsel %vm249_vm2, 0.0, %v910_v57  ;;  %v936_v61 = vsel %vm249_vm2, %v799_v35, %v912_v58  ;;  %v4262_v52 = vsub.s32 1, %v1360_v49  ;;  %v3110_v55 = vld [vmem:[%s4650_s8] ss:$0 sm:$0xff] }
 0x4cd   :  { %3351 = vmatmul.mubr.msk.f32.gmra.mrb[14].mxu0 %vm285_vm5, %v954_v59  ;;  %v3114_v56 = vld [vmem:[%s4651_s14] ss:$0 sm:$0xff] }
 0x4ce   :  { %3353 = vmatprep.mubr.msk.f32.mxu0 %vm3775_vm1, %v3771_v4  ;;  %v1576_v53 = vrot.slane %v190_v50, %v4262_v52  ;;  %v1608_v54 = vrot.slane %v191_v51, %v4262_v52 }
 0x4cf   :  { %v927_v62 = vpop.permute.xlu1 %926 }
 0x4d0   :  { %v941_v63 = vsel %vm256_vm3, %v935_v60, %v927_v62  ;;  %v942_v0 = vsel %vm256_vm3, %v936_v61, %v927_v62  ;;  %1578 = vrot.lane.b32.xlu0 %v1576_v53, %s3773_s28  ;;  %1610 = vrot.lane.b32.xlu1 %v1608_v54, %s3773_s28 }
 0x4d1   :  { %v955_v1 = vrot.slane %v941_v63, 4  ;;  %v956_v2 = vrot.slane %v942_v0, 4 }
 0x4d3   :  { %v957_v3 = vsel %vm695_vm9, %v955_v1, %v956_v2 }
 0x4d4   :  { %3354 = vmatmul.mubr.msk.f32.gmra.mrb[16].mxu0 %vm285_vm5, %v957_v3 }
 0x4d5   :  { %3369 = vmatprep.mubr.msk.f32.mxu0 %vm3775_vm1, %v3771_v4 }
 0x59c   :  { %v1036_v13 = vpop.f32.mrb[12].mxu0 }
 0x59d   :  { %v1037_v14 = vadd.f32 %v3102_v9, %v1036_v13  ;;  %v3349_v15 = vpop.f32.mrb[13].mxu0 }
 0x59f   :  { %v1050_v17 = vmax.f32 %v1037_v14, 0.0  ;;  %v1579_v14 = vpop.permute.xlu0 %1578 }
 0x5a0   :  { %v1041_v18 = vpop.f32.mrb[14].mxu0 }
 0x5a1   :  { %v1053_v19 = vadd.f32 %v1050_v17, %v879_v16  ;;  %v1042_v21 = vadd.f32 %v3102_v9, %v1041_v18  ;;  %v3352_v23 = vpop.f32.mrb[15].mxu0 }
 0x5a3   :  { %v1056_v26 = vmax.f32 %v1053_v19, 0.0  ;;  %v1051_v27 = vmax.f32 %v1042_v21, 0.0 }
 0x5a5   :  { %v1054_v22 = vadd.f32 %v1051_v27, %v884_v25  ;;  %3359 = vmatmul.mubr.msk.f32.vlgmr.msra.gmra.mrb[18].mxu1 %vm249_vm2, %v1056_v26 }
 0x5a6   :  { %3361 = vmatprep.mubr.msk.f32.mxu1 %vm3775_vm1, %v3771_v4  ;;  %3379 = vmatpush3.msra.mxu1 %v189_v47 }
 0x5a7   :  { %v1057_v5 = vmax.f32 %v1054_v22, 0.0  ;;  %v1046_v28 = vpop.f32.mrb[16].mxu0  ;;  %3556 = vmatprep.subr.bf16.mxu1 %v3774_v11  ;;  %v1611_v22 = vpop.permute.xlu1 %1610 }
 0x5a8   :  { %v1047_v6 = vadd.f32 %v3102_v9, %v1046_v28  ;;  %v3355_v29 = vpop.f32.mrb[17].mxu0  ;;  %v4282_v9 = vsub.s32 0, %v1360_v49 }
 0x5a9   :  { %3362 = vmatmul.mubr.msk.f32.gmra.mrb[20].mxu1 %vm249_vm2, %v1057_v5 }
 0x5aa   :  { %v1052_v31 = vmax.f32 %v1047_v6, 0.0  ;;  %3364 = vmatprep.mubr.msk.f32.mxu1 %vm3775_vm1, %v3771_v4  ;;  %v1362_v12 = vrot.slane %v190_v50, %v4282_v9  ;;  %v1378_v13 = vrot.slane %v191_v51, %v4282_v9 }
 0x5ac   :  { %v1055_v8 = vadd.f32 %v1052_v31, %v889_v30 }
 0x5ae   :  { %v1058_v32 = vmax.f32 %v1055_v8, 0.0 }
 0x5b0   :  { %3365 = vmatmul.mubr.msk.f32.gmra.mrb[22].mxu1 %vm249_vm2, %v1058_v32 }
 0x5b1   :  { %3380 = vmatprep.mubr.msk.f32.mxu1 %vm3775_vm1, %v3771_v4 }
 0x678   :  { %v1140_v35 = vpop.f32.mrb[18].mxu1 }
 0x679   :  { %v1141_v24 = vadd.f32 %v3106_v34, %v1140_v35  ;;  %v3360_v36 = vpop.f32.mrb[19].mxu1 }
 0x67b   :  { %vm1154_vm10 = vcmp.ge.f32.partialorder %v1141_v24, 0.0  ;;  %v1157_v10 = vmul.f32 0.01, %v1141_v24 }
 0x67c   :  { %v1145_v37 = vpop.f32.mrb[20].mxu1 }
 0x67d   :  { %v1160_v38 = vsel %vm1154_vm10, %v1141_v24, %v1157_v10  ;;  %v1146_v39 = vadd.f32 %v3106_v34, %v1145_v37  ;;  %v3363_v40 = vpop.f32.mrb[21].mxu1 }
 0x67e   :  { %3370 = vmatmul.mubr.msk.f32.vlgmr.msra.gmra.mrb[18].mxu0 %vm249_vm2, %v1160_v38 }
 0x67f   :  { %vm1155_vm11 = vcmp.ge.f32.partialorder %v1146_v39, 0.0  ;;  %v1158_v41 = vmul.f32 0.01, %v1146_v39  ;;  %3372 = vmatprep.mubr.msk.f32.mxu0 %vm3775_vm1, %v3771_v4 }
 0x681   :  { %v1161_v42 = vsel %vm1155_vm11, %v1146_v39, %v1158_v41 }
 0x682   :  { %3373 = vmatmul.mubr.msk.f32.gmra.mrb[20].mxu0 %vm249_vm2, %v1161_v42 }
 0x683   :  { %v1150_v43 = vpop.f32.mrb[22].mxu1  ;;  %3375 = vmatprep.mubr.msk.f32.mxu0 %vm3775_vm1, %v3771_v4 }
 0x684   :  { %v1151_v44 = vadd.f32 %v3106_v34, %v1150_v43  ;;  %v3366_v45 = vpop.f32.mrb[23].mxu1 }
 0x686   :  { %vm1156_vm12 = vcmp.ge.f32.partialorder %v1151_v44, 0.0  ;;  %v1159_v46 = vmul.f32 0.01, %v1151_v44 }
 0x688   :  { %v1162_v20 = vsel %vm1156_vm12, %v1151_v44, %v1159_v46 }
 0x689   :  { %3376 = vmatmul.mubr.msk.f32.gmra.mrb[22].mxu0 %vm249_vm2, %v1162_v20 }
 0x68a   :  { %3395 = vmatprep.mubr.msk.f32.mxu0 %vm3775_vm1, %v3771_v4 }
 0x751   :  { %v1244_v57 = vpop.f32.mrb[18].mxu0 }
 0x752   :  { %v1245_v58 = vadd.f32 %v3110_v55, %v1244_v57  ;;  %v3371_v59 = vpop.f32.mrb[19].mxu0 }
 0x754   :  { %v1264_v60 = vsub.f32 %v1245_v58, %v3114_v56  ;;  %3008 = vst.msk [vmem:[#allocation2] sm:$0xff] %vm249_vm2, %v1245_v58 }
 0x755   :  { %v1249_v61 = vpop.f32.mrb[20].mxu0 }
 0x756   :  { %v1250_v62 = vadd.f32 %v3110_v55, %v1249_v61  ;;  %v3374_v63 = vpop.f32.mrb[21].mxu0  ;;  %3381 = vmatmul.mubr.msk.f32.vlgmr.msra.gmra.mrb[24].mxu1 %vm249_vm2, %v1264_v60 }
 0x757   :  { %3383 = vmatprep.mubr.msk.f32.mxu1 %vm3775_vm1, %v3771_v4  ;;  %v4331_v63 = vld [vmem:[%s4652_s24] sm:$0xff] }
 0x758   :  { %v1265_v0 = vsub.f32 %v1250_v62, %v3114_v56  ;;  %3009 = vst.msk [vmem:[#allocation2 + $0x8] sm:$0xff] %vm249_vm2, %v1250_v62  ;;  %vm1356_vm13 = vcmp.gt.f32.partialorder %v4331_v63, 0.0 }
 0x75a   :  { %3384 = vmatmul.mubr.msk.f32.gmra.mrb[26].mxu1 %vm249_vm2, %v1265_v0  ;;  %v4334_v0 = vld [vmem:[%s4652_s24 + $0x8] sm:$0xff] }
 0x75b   :  { %3386 = vmatprep.mubr.msk.f32.mxu1 %vm3775_vm1, %v3771_v4  ;;  %vm1357_vm14 = vcmp.gt.f32.partialorder %v4334_v0, 0.0 }
 0x75c   :  { %v1254_v1 = vpop.f32.mrb[22].mxu0 }
 0x75d   :  { %v1255_v2 = vadd.f32 %v3110_v55, %v1254_v1  ;;  %v3377_v3 = vpop.f32.mrb[23].mxu0 }
 0x75f   :  { %v1266_v7 = vsub.f32 %v1255_v2, %v3114_v56  ;;  %3010 = vst.msk [vmem:[#allocation2 + $0x10] sm:$0xff] %vm249_vm2, %v1255_v2 }
 0x761   :  { %3387 = vmatmul.mubr.msk.f32.gmra.mrb[28].mxu1 %vm249_vm2, %v1266_v7 }
 0x762   :  { %3410 = vmatprep.mubr.msk.f32.mxu1 %vm3775_vm1, %v3771_v4 }
 0x829   :  { %v4286_v15 = vpop.f32.mrb[24].mxu1 }
 0x82a   :  { %v1581_v16 = vmul.f32 %v1579_v14, %v4286_v15  ;;  %v3382_v17 = vpop.f32.mrb[25].mxu1  ;;  %v1363_v18 = vmul.f32 %v1362_v12, %v4286_v15  ;;  %v1379_v19 = vmul.f32 %v1378_v13, %v4286_v15  ;;  %v1613_v6 = vmul.f32 %v1611_v22, %v4286_v15 }
 0x82c   :  { %1587 = vrot.lane.b32.xlu0 %v1581_v16, %s3777_s19  ;;  %v1366_v42 = vsel %vm249_vm2, %v1363_v18, 0.0  ;;  %v1382_v48 = vsel %vm249_vm2, %v1379_v19, 0.0 }
 0x82d   :  { %v4292_v21 = vpop.f32.mrb[26].mxu1 }
 0x82e   :  { %v3385_v23 = vpop.f32.mrb[27].mxu1  ;;  %v3554_v25 = vpack.c.bf16 %v4292_v21, %v4286_v15  ;;  %v1582_v26 = vmul.f32 %v1579_v14, %v4292_v21  ;;  %v1364_v27 = vmul.f32 %v1362_v12, %v4292_v21  ;;  %v1380_v5 = vmul.f32 %v1378_v13, %v4292_v21 }
 0x82f   :  { %v3623_v28 = vpack.i.bf16 %v4292_v21, %v4286_v15  ;;  %v1614_v34 = vmul.f32 %v1611_v22, %v4292_v21 }
 0x830   :  { %3555 = vmatpush3.bf16.msra.mxu0 %v3554_v25  ;;  %1589 = vrot.lane.b32.xlu1 %v1582_v26, %s3777_s19  ;;  %v1369_v37 = vsel %vm249_vm2, %v1364_v27, 0.0  ;;  %v1385_v43 = vsel %vm249_vm2, %v1380_v5, 0.0 }
 0x831   :  { %3393 = vmatprep.subr.mxu0 %v3771_v4 }
 0x834   :  { %v4304_v29 = vpop.f32.mrb[28].mxu1  ;;  %1619 = vrot.lane.b32.xlu1 %v1613_v6, %s3777_s19 }
 0x835   :  { %v3388_v30 = vpop.f32.mrb[29].mxu1  ;;  %3394 = vmatpush3.msra.mxu0 %v4304_v29  ;;  %v1583_v31 = vmul.f32 %v1579_v14, %v4304_v29  ;;  %v1615_v8 = vmul.f32 %v1611_v22, %v4304_v29  ;;  %v1365_v32 = vmul.f32 %v1362_v12, %v4304_v29  ;;  %v1381_v33 = vmul.f32 %v1378_v13, %v4304_v29  ;;  %v4339_v12 = vld [vmem:[%s4652_s24 + $0x10] sm:$0xff] }
 0x836   :  { %3419 = vmatprep.subr.mxu0 %v3771_v4  ;;  %vm1358_vm4 = vcmp.gt.f32.partialorder %v4339_v12, 0.0 }
 0x837   :  { %1591 = vrot.lane.b32.xlu0 %v1583_v31, %s3777_s19  ;;  %v1372_v45 = vsel %vm249_vm2, %v1365_v32, 0.0  ;;  %v1388_v49 = vsel %vm249_vm2, %v1381_v33, 0.0 }
 0x838   :  { %1623 = vrot.lane.b32.xlu1 %v1615_v8, %s3777_s19 }
 0x83b   :  { %1621 = vrot.lane.b32.xlu0 %v1614_v34, %s3777_s19 }
 0x89e   :  { %v1588_v35 = vpop.permute.xlu0 %1587 }
 0x89f   :  { %v1596_v24 = vsel %vm249_vm2, %v1588_v35, 0.0 }
 0x8a0   :  { %1597 = vadd.xlane.f32.xlu0 %v1596_v24 }
 0x8a2   :  { %v1590_v36 = vpop.permute.xlu1 %1589 }
 0x8a3   :  { %v1599_v10 = vsel %vm249_vm2, %v1590_v36, 0.0 }
 0x8a4   :  { %1600 = vadd.xlane.f32.xlu1 %v1599_v10 }
 0x8a6   :  { %v1620_v38 = vpop.permute.xlu1 %1619 }
 0x8a7   :  { %v1628_v41 = vsel %vm249_vm2, %v1620_v38, 0.0 }
 0x8a8   :  { %1370 = vadd.xlane.f32.xlu1 %v1369_v37 }
 0x8a9   :  { %v1592_v39 = vpop.permute.xlu0 %1591 }
 0x8aa   :  { %v1602_v40 = vsel %vm249_vm2, %v1592_v39, 0.0  ;;  %v1624_v44 = vpop.permute.xlu1 %1623 }
 0x8ab   :  { %1603 = vadd.xlane.f32.xlu0 %v1602_v40  ;;  %v1634_v20 = vsel %vm249_vm2, %v1624_v44, 0.0 }
 0x8ac   :  { %1629 = vadd.xlane.f32.xlu1 %v1628_v41 }
 0x8ad   :  { %v1622_v46 = vpop.permute.xlu0 %1621 }
 0x8ae   :  { %v1631_v47 = vsel %vm249_vm2, %v1622_v46, 0.0 }
 0x8af   :  { %1367 = vadd.xlane.f32.xlu0 %v1366_v42 }
 0x8b0   :  { %1386 = vadd.xlane.f32.xlu1 %v1385_v43 }
 0x8b3   :  { %1373 = vadd.xlane.f32.xlu0 %v1372_v45 }
 0x8b4   :  { %1635 = vadd.xlane.f32.xlu1 %v1634_v20 }
 0x8b7   :  { %1632 = vadd.xlane.f32.xlu0 %v1631_v47 }
 0x8bb   :  { %1383 = vadd.xlane.f32.xlu0 %v1382_v48 }
 0x8bf   :  { %1389 = vadd.xlane.f32.xlu0 %v1388_v49 }
 0x92d   :  { %v1598_v50 = vpop.xlane.xlu0 %1597 }
 0x92e   :  { %1637 = vxpose.xlu1.b32.start [1/3] (short) (narrow) %v1598_v50, 8 }
 0x931   :  { %v1601_v51 = vpop.xlane.xlu1 %1600 }
 0x932   :  { %1638 = vxpose.xlu1.b32.cont [2/3] (short) (narrow) %v1601_v51, 8 }
 0x935   :  { %v1371_v55 = vpop.xlane.xlu1 %1370 }
 0x938   :  { %v1604_v53 = vpop.xlane.xlu0 %1603 }
 0x939   :  { %1639 = vxpose.xlu1.b32.end [3/3] (short) (narrow) %v1604_v53, 8  ;;  %v1630_v57 = vpop.xlane.xlu1 %1629 }
 0x93c   :  { %v1368_v54 = vpop.xlane.xlu0 %1367 }
 0x93d   :  { %1391 = vxpose.xlu0.b32.start [1/3] (short) (narrow) %v1368_v54, 8  ;;  %v1387_v58 = vpop.xlane.xlu1 %1386 }
 0x940   :  { %v1374_v56 = vpop.xlane.xlu0 %1373 }
 0x941   :  { %1392 = vxpose.xlu0.b32.cont [2/3] (short) (narrow) %v1371_v55, 8  ;;  %v1636_v59 = vpop.xlane.xlu1 %1635 }
 0x944   :  { %v1633_v60 = vpop.xlane.xlu0 %1632 }
 0x945   :  { %1393 = vxpose.xlu0.b32.end [3/3] (short) (narrow) %v1374_v56, 8 }
 0x948   :  { %v1384_v1 = vpop.xlane.xlu0 %1383 }
 0x94c   :  { %v1390_v19 = vpop.xlane.xlu0 %1389 }
 0x9b1   :  { %v1653_v61 = vpop.trf.xlu1 }
 0x9b2   :  { %v1672_v62 = vrot.slane %v1653_v61, %v4282_v9 }
 0x9b4   :  { %v1673_v2 = vadd.f32 %v1672_v62, %v1630_v57  ;;  %v1674_v3 = vadd.f32 %v1672_v62, %v1633_v60  ;;  %v1675_v7 = vadd.f32 %v1672_v62, %v1636_v59 }
 0x9b6   :  { %vm1676_vm15 = vcmp.ge.f32.partialorder %v1673_v2, 0.0  ;;  %v1679_v13 = vmul.f32 0.2, %v1673_v2  ;;  %vm1677_vm0 = vcmp.ge.f32.partialorder %v1674_v3, 0.0  ;;  %v1680_v14 = vmul.f32 0.2, %v1674_v3 }
 0x9b7   :  { %vm1678_vm3 = vcmp.ge.f32.partialorder %v1675_v7, 0.0  ;;  %v1681_v16 = vmul.f32 0.2, %v1675_v7 }
 0x9b8   :  { %v1682_v17 = vsel %vm1676_vm15, %v1673_v2, %v1679_v13  ;;  %v1683_v18 = vsel %vm1677_vm0, %v1674_v3, %v1680_v14 }
 0x9b9   :  { %v1685_v23 = vsel %vm1356_vm13, %v1682_v17, -1e+30  ;;  %v1686_v25 = vsel %vm1357_vm14, %v1683_v18, -1e+30  ;;  %v1684_v26 = vsel %vm1678_vm3, %v1675_v7, %v1681_v16 }
 0x9ba   :  { %v1688_v27 = vsel %vm285_vm5, %v1685_v23, -inf  ;;  %v1691_v22 = vsel %vm285_vm5, %v1686_v25, -inf  ;;  %v1687_v5 = vsel %vm1358_vm4, %v1684_v26, -1e+30 }
 0x9bb   :  { %1689 = vmax.xlane.f32.xlu0 %v1688_v27  ;;  %1692 = vmax.xlane.f32.xlu1 %v1691_v22  ;;  %v1694_v31 = vsel %vm285_vm5, %v1687_v5, -inf }
 0x9bd   :  { %v1407_v6 = vpop.trf.xlu0 }
 0x9be   :  { %v1426_v30 = vrot.slane %v1407_v6, %v4282_v9 }
 0x9bf   :  { %1695 = vmax.xlane.f32.xlu1 %v1694_v31 }
 0x9c0   :  { %v1427_v8 = vadd.f32 %v1426_v30, %v1384_v1  ;;  %v1428_v32 = vadd.f32 %v1426_v30, %v1387_v58  ;;  %v1429_v33 = vadd.f32 %v1426_v30, %v1390_v19  ;;  %v4380_v30 = vld [vmem:[%s4653_s30] ss:$0 sm:$0xff] }
 0x9c2   :  { %vm1431_vm6 = vcmp.ge.f32.partialorder %v1428_v32, 0.0  ;;  %v1434_v34 = vmul.f32 0.2, %v1428_v32  ;;  %vm1430_vm7 = vcmp.ge.f32.partialorder %v1427_v8, 0.0  ;;  %v1433_v35 = vmul.f32 0.2, %v1427_v8 }
 0x9c3   :  { %vm1432_vm8 = vcmp.ge.f32.partialorder %v1429_v33, 0.0  ;;  %v1435_v24 = vmul.f32 0.2, %v1429_v33 }
 0x9c4   :  { %v1437_v36 = vsel %vm1431_vm6, %v1428_v32, %v1434_v34  ;;  %v1436_v10 = vsel %vm1430_vm7, %v1427_v8, %v1433_v35 }
 0x9c5   :  { %v1440_v37 = vsel %vm1357_vm14, %v1437_v36, -1e+30  ;;  %v1439_v38 = vsel %vm1356_vm13, %v1436_v10, -1e+30  ;;  %v1438_v39 = vsel %vm1432_vm8, %v1429_v33, %v1435_v24 }
 0x9c6   :  { %v1445_v40 = vsel %vm285_vm5, %v1440_v37, -inf  ;;  %v1442_v41 = vsel %vm285_vm5, %v1439_v38, -inf  ;;  %v1441_v42 = vsel %vm1358_vm4, %v1438_v39, -1e+30 }
 0x9c7   :  { %1446 = vmax.xlane.f32.xlu1 %v1445_v40  ;;  %1443 = vmax.xlane.f32.xlu0 %v1442_v41  ;;  %v1448_v43 = vsel %vm285_vm5, %v1441_v42, -inf }
 0x9cb   :  { %1449 = vmax.xlane.f32.xlu0 %v1448_v43 }
 0xa48   :  { %v1693_v44 = vpop.xlane.xlu1 %1692  ;;  %v1690_v45 = vpop.xlane.xlu0 %1689 }
 0xa49   :  { %v1697_v46 = vsub.f32 %v1685_v23, %v1690_v45  ;;  %v1698_v54 = vsub.f32 %v1686_v25, %v1693_v44 }
 0xa4b   :  { %v1700_v47 = vmul.f32 1.442695, %v1697_v46  ;;  %v1702_v60 = vmul.f32 1.442695, %v1698_v54 }
 0xa4c   :  { %v1696_v20 = vpop.xlane.xlu1 %1695 }
 0xa4d   :  { %v1699_v48 = vsub.f32 %v1687_v5, %v1696_v20  ;;  %3633 = vpow2.f32 %v1700_v47  ;;  %v194_v20 = vld [vmem:[%s4654_s6 + $0x8] sm:$0xff]  ;;  %v201_v47 = vld [vmem:[%s4655_s12] sm:$0xff] }
 0xa4f   :  { %v1704_v57 = vmul.f32 1.442695, %v1699_v48 }
 0xa54   :  { %v1447_v49 = vpop.xlane.xlu1 %1446  ;;  %v1444_v50 = vpop.xlane.xlu0 %1443 }
 0xa55   :  { %v1452_v51 = vsub.f32 %v1440_v37, %v1447_v49  ;;  %v1451_v53 = vsub.f32 %v1439_v38, %v1444_v50 }
 0xa57   :  { %v1456_v55 = vmul.f32 1.442695, %v1452_v51  ;;  %v1454_v56 = vmul.f32 1.442695, %v1451_v53  ;;  %v3634_v62 = vpop.eup %3633 }
 0xa58   :  { %v1450_v58 = vpop.xlane.xlu0 %1449  ;;  %v1706_v16 = vmul.f32 %v3634_v62, %v4331_v63 }
 0xa59   :  { %3635 = vpow2.f32 %v1456_v55  ;;  %v1453_v59 = vsub.f32 %v1441_v42, %v1450_v58  ;;  %v193_v58 = vld [vmem:[%s4654_s6] sm:$0xff] }
 0xa5a   :  { %3637 = vpow2.f32 %v1454_v56  ;;  %v1709_v25 = vsel %vm285_vm5, %v1706_v16, 0.0 }
 0xa5b   :  { %v1458_v61 = vmul.f32 1.442695, %v1453_v59  ;;  %3639 = vpow2.f32 %v1704_v57 }
 0xa5d   :  { %3641 = vpow2.f32 %v1458_v61 }
 0xa5e   :  { %3643 = vpow2.f32 %v1702_v60 }
 0xa63   :  { %v3636_v1 = vpop.eup %3635 }
 0xa64   :  { %v3638_v2 = vpop.eup %3637  ;;  %v1461_v3 = vmul.f32 %v3636_v1, %v4334_v0 }
 0xa65   :  { %v1460_v7 = vmul.f32 %v3638_v2, %v4331_v63  ;;  %v3640_v13 = vpop.eup %3639 }
 0xa66   :  { %v1466_v14 = vsel %vm285_vm5, %v1461_v3, 0.0  ;;  %v1708_v27 = vmul.f32 %v3640_v13, %v4339_v12 }
 0xa67   :  { %v3642_v17 = vpop.eup %3641  ;;  %1467 = vadd.xlane.f32.xlu1 %v1466_v14  ;;  %v1463_v18 = vsel %vm285_vm5, %v1460_v7, 0.0 }
 0xa68   :  { %v3644_v19 = vpop.eup %3643  ;;  %1464 = vadd.xlane.f32.xlu0 %v1463_v18  ;;  %v1462_v23 = vmul.f32 %v3642_v17, %v4339_v12  ;;  %v1715_v5 = vsel %vm285_vm5, %v1708_v27, 0.0 }
 0xa69   :  { %v1707_v22 = vmul.f32 %v3644_v19, %v4334_v0 }
 0xa6a   :  { %v1469_v26 = vsel %vm285_vm5, %v1462_v23, 0.0 }
 0xa6b   :  { %1710 = vadd.xlane.f32.xlu1 %v1709_v25  ;;  %v1712_v6 = vsel %vm285_vm5, %v1707_v22, 0.0 }
 0xa6c   :  { %1470 = vadd.xlane.f32.xlu0 %v1469_v26  ;;  %v3131_v26 = vld [vmem:[%s4656_s20] ss:$0 sm:$0xff] }
 0xa6f   :  { %1716 = vadd.xlane.f32.xlu1 %v1715_v5 }
 0xa70   :  { %1713 = vadd.xlane.f32.xlu0 %v1712_v6 }
 0xa80   :  { %3624 = vrot.lane.b32.xlu1 %v3623_v28, %s3777_s19 }
 0xa84   :  { %1736 = vrot.lane.b32.xlu1 %v4380_v30, %s3777_s19 }
 0xa86   :  { %1731 = vrot.lane.b32.xlu0 %v4304_v29, %s3777_s19 }
 0xaf4   :  { %v1468_v31 = vpop.xlane.xlu1 %1467 }
 0xaf5   :  { %v1465_v8 = vpop.xlane.xlu0 %1464 }
 0xaf6   :  { %3645 = vrcp.f32 %v1465_v8 }
 0xaf7   :  { %3647 = vrcp.f32 %v1468_v31 }
 0xaf8   :  { %v1711_v32 = vpop.xlane.xlu1 %1710 }
 0xaf9   :  { %v1471_v33 = vpop.xlane.xlu0 %1470  ;;  %3649 = vrcp.f32 %v1711_v32 }
 0xafa   :  { %3651 = vrcp.f32 %v1471_v33 }
 0xafc   :  { %v1717_v34 = vpop.xlane.xlu1 %1716 }
 0xafd   :  { %v1714_v35 = vpop.xlane.xlu0 %1713 }
 0xafe   :  { %3653 = vrcp.f32 %v1714_v35 }
 0xaff   :  { %3655 = vrcp.f32 %v1717_v34 }
 0xb00   :  { %v3646_v15 = vpop.eup %3645  ;;  %v3625_v21 = vpop.permute.xlu1 %3624 }
 0xb01   :  { %v1473_v28 = vmul.f32 %v3646_v15, %v1460_v7  ;;  %v3627_v29 = vunpack.i.h.bf16 %v3625_v21  ;;  %v3626_v24 = vunpack.i.l.bf16 %v3625_v21  ;;  %v3648_v36 = vpop.eup %3647  ;;  %v1732_v41 = vpop.permute.xlu0 %1731 }
 0xb02   :  { %v1475_v38 = vmul.f32 %v3648_v36, %v1461_v3 }
 0xb03   :  { %v3557_v10 = vpack.c.bf16 %v3627_v29, %v3626_v24  ;;  %3396 = vmatmul.mubr.msk.f32.vlgmr.msra.gmra.mrb[24].mxu0 %vm285_vm5, %v1473_v28  ;;  %v3650_v37 = vpop.eup %3649 }
 0xb04   :  { %3398 = vmatprep.mubr.msk.f32.mxu0 %vm3775_vm1, %v3771_v4  ;;  %v3652_v39 = vpop.eup %3651  ;;  %v1719_v40 = vmul.f32 %v3650_v37, %v1706_v16  ;;  %3420 = vmatpush3.msra.mxu0 %v194_v20  ;;  %v1737_v53 = vpop.permute.xlu1 %1736 }
 0xb05   :  { %3558 = vmatpush3.bf16.msra.mxu1 %v3557_v10  ;;  %v1477_v43 = vmul.f32 %v3652_v39, %v1462_v23  ;;  %3430 = vmatprep.subr.mxu0 %v3771_v4 }
 0xb06   :  { %3408 = vmatprep.subr.mxu1 %v3771_v4 }
 0xb07   :  { %3399 = vmatmul.mubr.msk.f32.gmra.mrb[26].mxu0 %vm285_vm5, %v1475_v38 }
 0xb08   :  { %3401 = vmatprep.mubr.msk.f32.mxu0 %vm3775_vm1, %v3771_v4  ;;  %v3654_v42 = vpop.eup %3653 }
 0xb09   :  { %3409 = vmatpush3.msra.mxu1 %v1732_v41  ;;  %v1721_v44 = vmul.f32 %v3654_v42, %v1707_v22  ;;  %v3656_v45 = vpop.eup %3655 }
 0xb0a   :  { %3411 = vmatmul.mubr.msk.f32.vlgmr.msra.gmra.mrb[30].mxu1 %vm285_vm5, %v1719_v40  ;;  %3441 = vmatprep.subr.mxu1 %v3771_v4  ;;  %v1723_v46 = vmul.f32 %v3656_v45, %v1708_v27 }
 0xb0b   :  { %3402 = vmatmul.mubr.msk.f32.gmra.mrb[28].mxu0 %vm285_vm5, %v1477_v43  ;;  %3413 = vmatprep.mubr.msk.f32.mxu1 %vm3775_vm1, %v3771_v4 }
 0xb0c   :  { %3421 = vmatprep.mubr.msk.f32.mxu0 %vm3775_vm1, %v3771_v4  ;;  %3442 = vmatpush3.msra.mxu1 %v201_v47 }
 0xb0d   :  { %3452 = vmatprep.subr.mxu1 %v3771_v4 }
 0xb0e   :  { %3414 = vmatmul.mubr.msk.f32.gmra.mrb[32].mxu1 %vm285_vm5, %v1721_v44 }
 0xb0f   :  { %3416 = vmatprep.mubr.msk.f32.mxu1 %vm3775_vm1, %v3771_v4 }
 0xb12   :  { %3417 = vmatmul.mubr.msk.f32.gmra.mrb[34].mxu1 %vm285_vm5, %v1723_v46 }
 0xb13   :  { %3443 = vmatprep.mubr.msk.f32.mxu1 %vm3775_vm1, %v3771_v4 }
 0xbd6   :  { %v1559_v48 = vpop.f32.mrb[24].mxu0 }
 0xbd7   :  { %v3397_v49 = vpop.f32.mrb[25].mxu0  ;;  %v1560_v7 = vadd.f32 %v4380_v30, %v1559_v48 }
 0xbda   :  { %v1564_v50 = vpop.f32.mrb[26].mxu0 }
 0xbdb   :  { %v3400_v51 = vpop.f32.mrb[27].mxu0  ;;  %v1565_v13 = vadd.f32 %v4380_v30, %v1564_v50 }
 0xbdc   :  { %v195_v51 = vld [vmem:[%s4657_s1] sm:$0xff] }
 0xbdd   :  { %v1814_v54 = vpop.f32.mrb[30].mxu1 }
 0xbde   :  { %v1569_v55 = vpop.f32.mrb[28].mxu0  ;;  %v1815_v56 = vadd.f32 %v1814_v54, %v1737_v53  ;;  %v3412_v57 = vpop.f32.mrb[31].mxu1  ;;  %v197_v54 = vld [vmem:[%s4659_s7] sm:$0x3] }
 0xbdf   :  { %v3403_v59 = vpop.f32.mrb[29].mxu0  ;;  %v1570_v14 = vadd.f32 %v4380_v30, %v1569_v55 }
 0xbe0   :  { %3422 = vmatmul.mubr.msk.f32.vlgmr.msra.gmra.mrb[30].mxu0 %vm249_vm2, %v1815_v56  ;;  %v2506_v56 = vrot.slane %v197_v54, %v4262_v52 }
 0xbe1   :  { %v1819_v60 = vpop.f32.mrb[32].mxu1  ;;  %3424 = vmatprep.mubr.msk.f32.mxu0 %vm3775_vm1, %v3771_v4  ;;  %3431 = vmatpush3.msra.mxu0 %v193_v58 }
 0xbe2   :  { %v1820_v61 = vadd.f32 %v1819_v60, %v1737_v53  ;;  %v3415_v62 = vpop.f32.mrb[33].mxu1  ;;  %3559 = vmatprep.subr.bf16.mxu0 %v3774_v11 }
 0xbe4   :  { %3425 = vmatmul.mubr.msk.f32.gmra.mrb[32].mxu0 %vm249_vm2, %v1820_v61 }
 0xbe5   :  { %v1824_v1 = vpop.f32.mrb[34].mxu1  ;;  %3427 = vmatprep.mubr.msk.f32.mxu0 %vm3775_vm1, %v3771_v4 }
 0xbe6   :  { %v1825_v2 = vadd.f32 %v1824_v1, %v1737_v53  ;;  %v3418_v3 = vpop.f32.mrb[35].mxu1  ;;  %v196_v53 = vld [vmem:[%s4658_s2] sm:$0x3] }
 0xbe7   :  { %v2474_v55 = vrot.slane %v196_v53, %v4262_v52  ;;  %v3135_v52 = vld [vmem:[%s4660_s10] ss:$0 sm:$0xff] }
 0xbe8   :  { %3428 = vmatmul.mubr.msk.f32.gmra.mrb[34].mxu0 %vm249_vm2, %v1825_v2 }
 0xbe9   :  { %3432 = vmatprep.mubr.msk.f32.mxu0 %vm3775_vm1, %v3771_v4 }
 0xbec   :  { %3433 = vmatmul.mubr.msk.f32.vlgmr.msra.gmra.mrb[30].mxu0 %vm249_vm2, %v1560_v7 }
 0xbed   :  { %3435 = vmatprep.mubr.msk.f32.mxu0 %vm3775_vm1, %v3771_v4 }
 0xbf0   :  { %3436 = vmatmul.mubr.msk.f32.gmra.mrb[32].mxu0 %vm249_vm2, %v1565_v13  ;;  %v3136_v13 = vld [vmem:[%s4661_s11] ss:$0 sm:$0xff] }
 0xbf1   :  { %3438 = vmatprep.mubr.msk.f32.mxu0 %vm3775_vm1, %v3771_v4 }
 0xbf4   :  { %3439 = vmatmul.mubr.msk.f32.gmra.mrb[34].mxu0 %vm249_vm2, %v1570_v14 }
 0xbf5   :  { %3469 = vmatprep.mubr.msk.f32.mxu0 %vm3775_vm1, %v3771_v4 }
 0xcbf   :  { %v1992_v16 = vpop.f32.mrb[30].mxu0 }
 0xcc0   :  { %v3434_v17 = vpop.f32.mrb[31].mxu0  ;;  %3444 = vmatmul.mubr.msk.f32.vlgmr.msra.gmra.mrb[36].mxu1 %vm249_vm2, %v1992_v16 }
 0xcc1   :  { %3446 = vmatprep.mubr.msk.f32.mxu1 %vm3775_vm1, %v3771_v4  ;;  %3453 = vmatpush3.msra.mxu1 %v195_v51 }
 0xcc2   :  { %3562 = vmatprep.subr.bf16.mxu1 %v3774_v11 }
 0xcc3   :  { %v1997_v18 = vpop.f32.mrb[32].mxu0 }
 0xcc4   :  { %v3437_v19 = vpop.f32.mrb[33].mxu0  ;;  %3447 = vmatmul.mubr.msk.f32.gmra.mrb[38].mxu1 %vm249_vm2, %v1997_v18 }
 0xcc5   :  { %3449 = vmatprep.mubr.msk.f32.mxu1 %vm3775_vm1, %v3771_v4 }
 0xcc7   :  { %v2002_v23 = vpop.f32.mrb[34].mxu0 }
 0xcc8   :  { %v3440_v25 = vpop.f32.mrb[35].mxu0  ;;  %3450 = vmatmul.mubr.msk.f32.gmra.mrb[40].mxu1 %vm249_vm2, %v2002_v23 }
 0xcc9   :  { %3454 = vmatprep.mubr.msk.f32.mxu1 %vm3775_vm1, %v3771_v4 }
 0xd93   :  { %v2087_v27 = vpop.f32.mrb[36].mxu1 }
 0xd94   :  { %v2088_v22 = vadd.f32 %v3131_v26, %v2087_v27  ;;  %v3445_v5 = vpop.f32.mrb[37].mxu1 }
 0xd95   :  { %v2260_v5 = vrot.slane %v196_v53, %v4282_v9 }
 0xd96   :  { %v2104_v6 = vmul.f32 0.01, %v2088_v22  ;;  %vm2101_vm9 = vcmp.ge.f32.partialorder %v2088_v22, 0.0 }
 0xd97   :  { %v2092_v30 = vpop.f32.mrb[38].mxu1 }
 0xd98   :  { %v2093_v31 = vadd.f32 %v3131_v26, %v2092_v30  ;;  %v3448_v8 = vpop.f32.mrb[39].mxu1  ;;  %v2107_v32 = vsel %vm2101_vm9, %v2088_v22, %v2104_v6  ;;  %v2276_v6 = vrot.slane %v197_v54, %v4282_v9 }
 0xd99   :  { %v2110_v33 = vsel %vm249_vm2, %v2107_v32, 0.0 }
 0xd9a   :  { %v2105_v34 = vmul.f32 0.01, %v2093_v31  ;;  %2111 = vadd.xlane.f32.xlu1 %v2110_v33  ;;  %vm2102_vm10 = vcmp.ge.f32.partialorder %v2093_v31, 0.0 }
 0xd9b   :  { %v2097_v35 = vpop.f32.mrb[40].mxu1 }
 0xd9c   :  { %v2098_v15 = vadd.f32 %v3131_v26, %v2097_v35  ;;  %v3451_v21 = vpop.f32.mrb[41].mxu1  ;;  %v2108_v28 = vsel %vm2102_vm10, %v2093_v31, %v2105_v34 }
 0xd9d   :  { %v2113_v29 = vsel %vm249_vm2, %v2108_v28, 0.0 }
 0xd9e   :  { %v2106_v24 = vmul.f32 0.01, %v2098_v15  ;;  %2114 = vadd.xlane.f32.xlu0 %v2113_v29  ;;  %vm2103_vm11 = vcmp.ge.f32.partialorder %v2098_v15, 0.0 }
 0xda0   :  { %v2109_v36 = vsel %vm2103_vm11, %v2098_v15, %v2106_v24 }
 0xda1   :  { %v2116_v10 = vsel %vm249_vm2, %v2109_v36, 0.0 }
 0xda2   :  { %2117 = vadd.xlane.f32.xlu0 %v2116_v10 }
 0xe27   :  { %v2112_v37 = vpop.xlane.xlu1 %2111 }
 0xe28   :  { %v2120_v38 = vmul.f32 0.125, %v2112_v37 }
 0xe2a   :  { %v2123_v39 = vsub.f32 %v2107_v32, %v2120_v38 }
 0xe2b   :  { %v2115_v40 = vpop.xlane.xlu0 %2114 }
 0xe2c   :  { %v2121_v41 = vmul.f32 0.125, %v2115_v40  ;;  %v2126_v42 = vmul.f32 %v2123_v39, %v2123_v39 }
 0xe2e   :  { %v2124_v43 = vsub.f32 %v2108_v28, %v2121_v41  ;;  %v2129_v44 = vsel %vm249_vm2, %v2126_v42, 0.0 }
 0xe2f   :  { %2130 = vadd.xlane.f32.xlu1 %v2129_v44  ;;  %v2118_v45 = vpop.xlane.xlu0 %2117 }
 0xe30   :  { %v2122_v46 = vmul.f32 0.125, %v2118_v45  ;;  %v2127_v20 = vmul.f32 %v2124_v43, %v2124_v43 }
 0xe32   :  { %v2125_v47 = vsub.f32 %v2109_v36, %v2122_v46  ;;  %v2132_v48 = vsel %vm249_vm2, %v2127_v20, 0.0 }
 0xe33   :  { %2133 = vadd.xlane.f32.xlu0 %v2132_v48 }
 0xe34   :  { %v2128_v49 = vmul.f32 %v2125_v47, %v2125_v47 }
 0xe36   :  { %v2135_v50 = vsel %vm249_vm2, %v2128_v49, 0.0 }
 0xe37   :  { %2136 = vadd.xlane.f32.xlu1 %v2135_v50 }
 0xe48   :  { %2508 = vrot.lane.b32.xlu1 %v2506_v56, %s3773_s28 }
 0xe49   :  { %2476 = vrot.lane.b32.xlu0 %v2474_v55, %s3773_s28 }
 0xebc   :  { %v2131_v57 = vpop.xlane.xlu1 %2130 }
 0xebd   :  { %v2138_v58 = vmul.f32 0.125, %v2131_v57 }
 0xebf   :  { %v2141_v59 = vadd.f32 1e-05, %v2138_v58 }
 0xec0   :  { %v2134_v60 = vpop.xlane.xlu0 %2133 }
 0xec1   :  { %3657 = vrsqrt.f32 %v2141_v59  ;;  %v2139_v61 = vmul.f32 0.125, %v2134_v60 }
 0xec3   :  { %v2142_v62 = vadd.f32 1e-05, %v2139_v61 }
 0xec4   :  { %v2137_v11 = vpop.xlane.xlu1 %2136  ;;  %v2477_v30 = vpop.permute.xlu0 %2476 }
 0xec5   :  { %3659 = vrsqrt.f32 %v2142_v62  ;;  %v2140_v1 = vmul.f32 0.125, %v2137_v11 }
 0xec7   :  { %v2143_v2 = vadd.f32 1e-05, %v2140_v1 }
 0xec8   :  { %v2509_v24 = vpop.permute.xlu1 %2508 }
 0xec9   :  { %3661 = vrsqrt.f32 %v2143_v2 }
 0xecb   :  { %v3658_v3 = vpop.eup %3657 }
 0xecc   :  { %v2147_v7 = vmul.f32 %v3658_v3, %v2123_v39 }
 0xece   :  { %v2156_v14 = vmul.f32 %v3135_v52, %v2147_v7 }
 0xecf   :  { %v3660_v16 = vpop.eup %3659 }
 0xed0   :  { %v2165_v17 = vadd.f32 %v3136_v13, %v2156_v14  ;;  %v2148_v18 = vmul.f32 %v3660_v16, %v2124_v43 }
 0xed2   :  { %3455 = vmatmul.mubr.msk.f32.vlgmr.msra.gmra.mrb[42].mxu1 %vm249_vm2, %v2165_v17  ;;  %v2157_v19 = vmul.f32 %v3135_v52, %v2148_v18 }
 0xed3   :  { %v3662_v23 = vpop.eup %3661  ;;  %3457 = vmatprep.mubr.msk.f32.mxu1 %vm3775_vm1, %v3771_v4 }
 0xed4   :  { %v2166_v25 = vadd.f32 %v3136_v13, %v2157_v19  ;;  %v2149_v26 = vmul.f32 %v3662_v23, %v2125_v47 }
 0xed6   :  { %3458 = vmatmul.mubr.msk.f32.gmra.mrb[44].mxu1 %vm249_vm2, %v2166_v25  ;;  %v2158_v27 = vmul.f32 %v3135_v52, %v2149_v26 }
 0xed7   :  { %3460 = vmatprep.mubr.msk.f32.mxu1 %vm3775_vm1, %v3771_v4 }
 0xed8   :  { %v2167_v22 = vadd.f32 %v3136_v13, %v2158_v27 }
 0xeda   :  { %3461 = vmatmul.mubr.msk.f32.gmra.mrb[46].mxu1 %vm249_vm2, %v2167_v22 }
 0xedb   :  { %3484 = vmatprep.mubr.msk.f32.mxu1 %vm3775_vm1, %v3771_v4 }
 0xfa5   :  { %v4468_v31 = vpop.f32.mrb[42].mxu1 }
 0xfa6   :  { %v3456_v8 = vpop.f32.mrb[43].mxu1  ;;  %v2479_v32 = vmul.f32 %v2477_v30, %v4468_v31  ;;  %v2261_v33 = vmul.f32 %v2260_v5, %v4468_v31  ;;  %v2277_v34 = vmul.f32 %v2276_v6, %v4468_v31  ;;  %v2511_v39 = vmul.f32 %v2509_v24, %v4468_v31 }
 0xfa8   :  { %2485 = vrot.lane.b32.xlu1 %v2479_v32, %s3777_s19  ;;  %v2264_v48 = vsel %vm249_vm2, %v2261_v33, 0.0  ;;  %v2280_v58 = vsel %vm249_vm2, %v2277_v34, 0.0 }
 0xfa9   :  { %v4474_v35 = vpop.f32.mrb[44].mxu1 }
 0xfaa   :  { %v3459_v15 = vpop.f32.mrb[45].mxu1  ;;  %v2480_v21 = vmul.f32 %v2477_v30, %v4474_v35  ;;  %v3560_v28 = vpack.c.bf16 %v4474_v35, %v4468_v31  ;;  %v2262_v29 = vmul.f32 %v2260_v5, %v4474_v35  ;;  %v2278_v36 = vmul.f32 %v2276_v6, %v4474_v35 }
 0xfab   :  { %v3628_v10 = vpack.i.bf16 %v4474_v35, %v4468_v31  ;;  %v2512_v44 = vmul.f32 %v2509_v24, %v4474_v35 }
 0xfac   :  { %2487 = vrot.lane.b32.xlu0 %v2480_v21, %s3777_s19  ;;  %3561 = vmatpush3.bf16.msra.mxu0 %v3560_v28  ;;  %v2267_v54 = vsel %vm249_vm2, %v2262_v29, 0.0  ;;  %v2283_v59 = vsel %vm249_vm2, %v2278_v36, 0.0 }
 0xfad   :  { %v4484_v37 = vpop.f32.mrb[46].mxu1  ;;  %3467 = vmatprep.subr.mxu0 %v3771_v4 }
 0xfae   :  { %v3462_v38 = vpop.f32.mrb[47].mxu1  ;;  %v2481_v40 = vmul.f32 %v2477_v30, %v4484_v37  ;;  %v2263_v41 = vmul.f32 %v2260_v5, %v4484_v37  ;;  %v2279_v42 = vmul.f32 %v2276_v6, %v4484_v37  ;;  %v2513_v43 = vmul.f32 %v2509_v24, %v4484_v37 }
 0xfb0   :  { %2517 = vrot.lane.b32.xlu0 %v2511_v39, %s3777_s19  ;;  %2489 = vrot.lane.b32.xlu1 %v2481_v40, %s3777_s19  ;;  %v2270_v51 = vsel %vm249_vm2, %v2263_v41, 0.0  ;;  %v2286_v60 = vsel %vm249_vm2, %v2279_v42, 0.0 }
 0xfb1   :  { %3468 = vmatpush3.msra.mxu0 %v4484_v37 }
 0xfb2   :  { %3493 = vmatprep.subr.mxu0 %v3771_v4 }
 0xfb4   :  { %2521 = vrot.lane.b32.xlu0 %v2513_v43, %s3777_s19  ;;  %2519 = vrot.lane.b32.xlu1 %v2512_v44, %s3777_s19 }
0x101a   :  { %v2486_v45 = vpop.permute.xlu1 %2485 }
0x101b   :  { %v2494_v46 = vsel %vm249_vm2, %v2486_v45, 0.0 }
0x101c   :  { %2495 = vadd.xlane.f32.xlu1 %v2494_v46 }
0x101e   :  { %v2488_v20 = vpop.permute.xlu0 %2487 }
0x101f   :  { %v2497_v47 = vsel %vm249_vm2, %v2488_v20, 0.0 }
0x1020   :  { %2498 = vadd.xlane.f32.xlu0 %v2497_v47  ;;  %2265 = vadd.xlane.f32.xlu1 %v2264_v48 }
0x1022   :  { %v2490_v49 = vpop.permute.xlu1 %2489  ;;  %v2518_v56 = vpop.permute.xlu0 %2517 }
0x1023   :  { %v2500_v50 = vsel %vm249_vm2, %v2490_v49, 0.0  ;;  %v2526_v57 = vsel %vm249_vm2, %v2518_v56, 0.0 }
0x1024   :  { %2501 = vadd.xlane.f32.xlu0 %v2500_v50  ;;  %2271 = vadd.xlane.f32.xlu1 %v2270_v51 }
0x1026   :  { %v2520_v53 = vpop.permute.xlu1 %2519  ;;  %v2522_v61 = vpop.permute.xlu0 %2521 }
0x1027   :  { %v2529_v55 = vsel %vm249_vm2, %v2520_v53, 0.0  ;;  %v2532_v62 = vsel %vm249_vm2, %v2522_v61, 0.0 }
0x1028   :  { %2268 = vadd.xlane.f32.xlu0 %v2267_v54  ;;  %2530 = vadd.xlane.f32.xlu1 %v2529_v55 }
0x102c   :  { %2527 = vadd.xlane.f32.xlu0 %v2526_v57  ;;  %2281 = vadd.xlane.f32.xlu1 %v2280_v58 }
0x1030   :  { %2284 = vadd.xlane.f32.xlu0 %v2283_v59  ;;  %2287 = vadd.xlane.f32.xlu1 %v2286_v60 }
0x1034   :  { %2533 = vadd.xlane.f32.xlu0 %v2532_v62 }
0x10a9   :  { %v2496_v11 = vpop.xlane.xlu1 %2495 }
0x10aa   :  { %2535 = vxpose.xlu0.b32.start [1/3] (short) (narrow) %v2496_v11, 8 }
0x10ad   :  { %v2499_v1 = vpop.xlane.xlu0 %2498  ;;  %v2266_v2 = vpop.xlane.xlu1 %2265 }
0x10ae   :  { %2536 = vxpose.xlu0.b32.cont [2/3] (short) (narrow) %v2499_v1, 8  ;;  %2289 = vxpose.xlu1.b32.start [1/3] (short) (narrow) %v2266_v2, 8 }
0x10b1   :  { %v2502_v3 = vpop.xlane.xlu0 %2501  ;;  %v2272_v7 = vpop.xlane.xlu1 %2271 }
0x10b2   :  { %2537 = vxpose.xlu0.b32.end [3/3] (short) (narrow) %v2502_v3, 8 }
0x10b5   :  { %v2269_v52 = vpop.xlane.xlu0 %2268  ;;  %v2531_v16 = vpop.xlane.xlu1 %2530 }
0x10b6   :  { %2290 = vxpose.xlu1.b32.cont [2/3] (short) (narrow) %v2269_v52, 8 }
0x10b9   :  { %v2528_v13 = vpop.xlane.xlu0 %2527  ;;  %v2282_v18 = vpop.xlane.xlu1 %2281 }
0x10ba   :  { %2291 = vxpose.xlu1.b32.end [3/3] (short) (narrow) %v2272_v7, 8 }
0x10bd   :  { %v2285_v14 = vpop.xlane.xlu0 %2284  ;;  %v2288_v22 = vpop.xlane.xlu1 %2287 }
0x10c1   :  { %v2534_v17 = vpop.xlane.xlu0 %2533 }
0x112a   :  { %v2551_v19 = vpop.trf.xlu0 }
0x112b   :  { %v2570_v23 = vrot.slane %v2551_v19, %v4282_v9 }
0x112d   :  { %v2571_v25 = vadd.f32 %v2570_v23, %v2528_v13  ;;  %v2572_v26 = vadd.f32 %v2570_v23, %v2531_v16  ;;  %v2573_v27 = vadd.f32 %v2570_v23, %v2534_v17 }
0x112f   :  { %vm2574_vm12 = vcmp.ge.f32.partialorder %v2571_v25, 0.0  ;;  %v2577_v5 = vmul.f32 0.2, %v2571_v25  ;;  %vm2575_vm15 = vcmp.ge.f32.partialorder %v2572_v26, 0.0  ;;  %v2578_v6 = vmul.f32 0.2, %v2572_v26 }
0x1130   :  { %vm2576_vm0 = vcmp.ge.f32.partialorder %v2573_v27, 0.0  ;;  %v2579_v30 = vmul.f32 0.2, %v2573_v27 }
0x1131   :  { %v2580_v8 = vsel %vm2574_vm12, %v2571_v25, %v2577_v5  ;;  %v2581_v32 = vsel %vm2575_vm15, %v2572_v26, %v2578_v6 }
0x1132   :  { %v2305_v33 = vpop.trf.xlu1  ;;  %v2583_v34 = vsel %vm1356_vm13, %v2580_v8, -1e+30  ;;  %v2584_v15 = vsel %vm1357_vm14, %v2581_v32, -1e+30  ;;  %v2582_v21 = vsel %vm2576_vm0, %v2573_v27, %v2579_v30 }
0x1133   :  { %v2324_v28 = vrot.slane %v2305_v33, %v4282_v9  ;;  %v2586_v29 = vsel %vm285_vm5, %v2583_v34, -inf  ;;  %v2589_v24 = vsel %vm285_vm5, %v2584_v15, -inf  ;;  %v2585_v36 = vsel %vm1358_vm4, %v2582_v21, -1e+30  ;;  %v4550_v21 = vld [vmem:[%s4662_s15] ss:$0 sm:$0xff] }
0x1134   :  { %2587 = vmax.xlane.f32.xlu0 %v2586_v29  ;;  %2590 = vmax.xlane.f32.xlu1 %v2589_v24  ;;  %v2592_v41 = vsel %vm285_vm5, %v2585_v36, -inf }
0x1135   :  { %v2325_v38 = vadd.f32 %v2324_v28, %v2282_v18  ;;  %v2326_v39 = vadd.f32 %v2324_v28, %v2285_v14  ;;  %v2327_v40 = vadd.f32 %v2324_v28, %v2288_v22 }
0x1137   :  { %vm2329_vm3 = vcmp.ge.f32.partialorder %v2326_v39, 0.0  ;;  %v2332_v42 = vmul.f32 0.2, %v2326_v39  ;;  %vm2328_vm6 = vcmp.ge.f32.partialorder %v2325_v38, 0.0  ;;  %v2331_v43 = vmul.f32 0.2, %v2325_v38 }
0x1138   :  { %2593 = vmax.xlane.f32.xlu0 %v2592_v41  ;;  %vm2330_vm7 = vcmp.ge.f32.partialorder %v2327_v40, 0.0  ;;  %v2333_v9 = vmul.f32 0.2, %v2327_v40 }
0x1139   :  { %v2335_v44 = vsel %vm2329_vm3, %v2326_v39, %v2332_v42  ;;  %v2334_v45 = vsel %vm2328_vm6, %v2325_v38, %v2331_v43 }
0x113a   :  { %v2338_v46 = vsel %vm1357_vm14, %v2335_v44, -1e+30  ;;  %v2337_v20 = vsel %vm1356_vm13, %v2334_v45, -1e+30  ;;  %v2336_v47 = vsel %vm2330_vm7, %v2327_v40, %v2333_v9 }
0x113b   :  { %v2343_v48 = vsel %vm285_vm5, %v2338_v46, -inf  ;;  %v2340_v49 = vsel %vm285_vm5, %v2337_v20, -inf  ;;  %v2339_v50 = vsel %vm1358_vm4, %v2336_v47, -1e+30 }
0x113c   :  { %2344 = vmax.xlane.f32.xlu0 %v2343_v48  ;;  %2341 = vmax.xlane.f32.xlu1 %v2340_v49  ;;  %v2346_v51 = vsel %vm285_vm5, %v2339_v50, -inf  ;;  %v200_v49 = vld [vmem:[%s4663_s16 + $0x8] sm:$0xff] }
0x1140   :  { %2347 = vmax.xlane.f32.xlu1 %v2346_v51 }
0x11c1   :  { %v2588_v53 = vpop.xlane.xlu0 %2587  ;;  %v2591_v55 = vpop.xlane.xlu1 %2590 }
0x11c2   :  { %v2595_v54 = vsub.f32 %v2583_v34, %v2588_v53  ;;  %v2596_v11 = vsub.f32 %v2584_v15, %v2591_v55 }
0x11c4   :  { %v2598_v57 = vmul.f32 1.442695, %v2595_v54  ;;  %v2600_v13 = vmul.f32 1.442695, %v2596_v11 }
0x11c5   :  { %v2594_v56 = vpop.xlane.xlu0 %2593 }
0x11c6   :  { %v2597_v58 = vsub.f32 %v2585_v36, %v2594_v56  ;;  %3663 = vpow2.f32 %v2598_v57 }
0x11c8   :  { %v2602_v3 = vmul.f32 1.442695, %v2597_v58 }
0x11c9   :  { %v2345_v59 = vpop.xlane.xlu0 %2344  ;;  %v2342_v60 = vpop.xlane.xlu1 %2341 }
0x11ca   :  { %v2350_v61 = vsub.f32 %v2338_v46, %v2345_v59  ;;  %v2349_v62 = vsub.f32 %v2337_v20, %v2342_v60 }
0x11cc   :  { %v2354_v1 = vmul.f32 1.442695, %v2350_v61  ;;  %v2352_v2 = vmul.f32 1.442695, %v2349_v62  ;;  %v199_v61 = vld [vmem:[%s4663_s16] sm:$0xff] }
0x11cd   :  { %v2348_v52 = vpop.xlane.xlu1 %2347 }
0x11ce   :  { %3665 = vpow2.f32 %v2354_v1  ;;  %v2351_v7 = vsub.f32 %v2339_v50, %v2348_v52  ;;  %v205_v50 = vld [vmem:[%s3954_s4] sm:$0xff]  ;;  %s3778_s4 = smov [#allocation2]  }
0x11cf   :  { %3667 = vpow2.f32 %v2352_v2  ;;  %s3019_s18 = sshll.u32 %s3778_s4, 4  ;;  %s3020_s18 = int_to_ptr.vmem [resolvable:$true] %s3019_s18 }
0x11d0   :  { %v2356_v14 = vmul.f32 1.442695, %v2351_v7  ;;  %3669 = vpow2.f32 %v2602_v3  ;;  %v3664_v16 = vpop.eup %3663  ;;  %s3687_s22 = scalar_lea.vmem %s3020_s18, 384  ;;  %p3692_p1 = scmp.lt.s32.totalorder %s3020_s18, %s3020_s18 }
0x11d1   :  { %v2604_v27 = vmul.f32 %v3664_v16, %v4331_v63  ;;  %p3688_p0 = scmp.ne.s32.totalorder %s3020_s18, %s3687_s22  ;;  %p3693_p2 = scmp.lt.s32.totalorder %s3687_s22, %s3687_s22 }
0x11d2   :  { %3671 = vpow2.f32 %v2356_v14 }
0x11d3   :  { %3673 = vpow2.f32 %v2600_v13  ;;  %v2607_v8 = vsel %vm285_vm5, %v2604_v27, 0.0  ;;  %p3694_p3 = por %p3693_p2, %p3692_p1 }
0x11d5   :  { %p3695_p4 = pnand %p3694_p3, %p3688_p0 }
0x11d8   :  { %v3666_v17 = vpop.eup %3665 }
0x11d9   :  { %v3668_v18 = vpop.eup %3667  ;;  %v2359_v19 = vmul.f32 %v3666_v17, %v4334_v0 }
0x11da   :  { %v2358_v23 = vmul.f32 %v3668_v18, %v4331_v63  ;;  %v3670_v25 = vpop.eup %3669 }
0x11db   :  { %v2364_v26 = vsel %vm285_vm5, %v2359_v19, 0.0  ;;  %v2606_v33 = vmul.f32 %v3670_v25, %v4339_v12 }
0x11dc   :  { %v3672_v22 = vpop.eup %3671  ;;  %2365 = vadd.xlane.f32.xlu0 %v2364_v26  ;;  %v2361_v5 = vsel %vm285_vm5, %v2358_v23, 0.0 }
0x11dd   :  { %v3674_v6 = vpop.eup %3673  ;;  %2362 = vadd.xlane.f32.xlu1 %v2361_v5  ;;  %v2360_v30 = vmul.f32 %v3672_v22, %v4339_v12  ;;  %v2613_v63 = vsel %vm285_vm5, %v2606_v33, 0.0 }
0x11de   :  { %v2605_v34 = vmul.f32 %v3674_v6, %v4334_v0 }
0x11df   :  { %v2367_v32 = vsel %vm285_vm5, %v2360_v30, 0.0 }
0x11e0   :  { %2608 = vadd.xlane.f32.xlu0 %v2607_v8  ;;  %v2610_v15 = vsel %vm285_vm5, %v2605_v34, 0.0 }
0x11e1   :  { %2368 = vadd.xlane.f32.xlu1 %v2367_v32 }
0x11e4   :  { %2614 = vadd.xlane.f32.xlu0 %v2613_v63 }
0x11e5   :  { %2611 = vadd.xlane.f32.xlu1 %v2610_v15 }
0x11f6   :  { %2629 = vrot.lane.b32.xlu1 %v4484_v37, %s3777_s19 }
0x11fa   :  { %3629 = vrot.lane.b32.xlu0 %v3628_v10, %s3777_s19  ;;  %2634 = vrot.lane.b32.xlu1 %v4550_v21, %s3777_s19 }
0x1269   :  { %v2366_v0 = vpop.xlane.xlu0 %2365 }
0x126a   :  { %v2363_v12 = vpop.xlane.xlu1 %2362 }
0x126b   :  { %3675 = vrcp.f32 %v2363_v12 }
0x126c   :  { %3677 = vrcp.f32 %v2366_v0 }
0x126d   :  { %v2609_v28 = vpop.xlane.xlu0 %2608 }
0x126e   :  { %v2369_v29 = vpop.xlane.xlu1 %2368  ;;  %3679 = vrcp.f32 %v2609_v28 }
0x126f   :  { %3681 = vrcp.f32 %v2369_v29 }
0x1271   :  { %v2615_v24 = vpop.xlane.xlu0 %2614 }
0x1272   :  { %v2612_v37 = vpop.xlane.xlu1 %2611 }
0x1273   :  { %3683 = vrcp.f32 %v2612_v37 }
0x1274   :  { %3685 = vrcp.f32 %v2615_v24 }
0x1275   :  { %v3676_v36 = vpop.eup %3675  ;;  %v3630_v38 = vpop.permute.xlu0 %3629 }
0x1276   :  { %v2371_v31 = vmul.f32 %v3676_v36, %v2358_v23  ;;  %v3632_v35 = vunpack.i.h.bf16 %v3630_v38  ;;  %v3631_v10 = vunpack.i.l.bf16 %v3630_v38  ;;  %v3678_v39 = vpop.eup %3677  ;;  %v2630_v44 = vpop.permute.xlu1 %2629 }
0x1277   :  { %v2373_v42 = vmul.f32 %v3678_v39, %v2359_v19 }
0x1278   :  { %v3563_v40 = vpack.c.bf16 %v3632_v35, %v3631_v10  ;;  %3470 = vmatmul.mubr.msk.f32.vlgmr.msra.gmra.mrb[36].mxu0 %vm285_vm5, %v2371_v31  ;;  %v3680_v41 = vpop.eup %3679 }
0x1279   :  { %3472 = vmatprep.mubr.msk.f32.mxu0 %vm3775_vm1, %v3771_v4  ;;  %v3682_v43 = vpop.eup %3681  ;;  %v2617_v9 = vmul.f32 %v3680_v41, %v2604_v27  ;;  %3494 = vmatpush3.msra.mxu0 %v200_v49 }
0x127a   :  { %3564 = vmatpush3.bf16.msra.mxu1 %v3563_v40  ;;  %v2375_v46 = vmul.f32 %v3682_v43, %v2360_v30  ;;  %3504 = vmatprep.subr.mxu0 %v3771_v4  ;;  %v2635_v56 = vpop.permute.xlu1 %2634 }
0x127b   :  { %3482 = vmatprep.subr.mxu1 %v3771_v4 }
0x127c   :  { %3473 = vmatmul.mubr.msk.f32.gmra.mrb[38].mxu0 %vm285_vm5, %v2373_v42 }
0x127d   :  { %3475 = vmatprep.mubr.msk.f32.mxu0 %vm3775_vm1, %v3771_v4  ;;  %v3684_v45 = vpop.eup %3683 }
0x127e   :  { %3483 = vmatpush3.msra.mxu1 %v2630_v44  ;;  %v2619_v20 = vmul.f32 %v3684_v45, %v2605_v34  ;;  %v3686_v47 = vpop.eup %3685 }
0x127f   :  { %3485 = vmatmul.mubr.msk.f32.vlgmr.msra.gmra.mrb[48].mxu1 %vm285_vm5, %v2617_v9  ;;  %3515 = vmatprep.subr.mxu1 %v3771_v4  ;;  %v2621_v48 = vmul.f32 %v3686_v47, %v2606_v33 }
0x1280   :  { %3476 = vmatmul.mubr.msk.f32.gmra.mrb[40].mxu0 %vm285_vm5, %v2375_v46  ;;  %3487 = vmatprep.mubr.msk.f32.mxu1 %vm3775_vm1, %v3771_v4 }
0x1281   :  { %3495 = vmatprep.mubr.msk.f32.mxu0 %vm3775_vm1, %v3771_v4  ;;  %3516 = vmatpush3.msra.mxu1 %v205_v50 }
0x1283   :  { %3488 = vmatmul.mubr.msk.f32.gmra.mrb[50].mxu1 %vm285_vm5, %v2619_v20 }
0x1284   :  { %3490 = vmatprep.mubr.msk.f32.mxu1 %vm3775_vm1, %v3771_v4 }
0x1287   :  { %3491 = vmatmul.mubr.msk.f32.gmra.mrb[52].mxu1 %vm285_vm5, %v2621_v48 }
0x1288   :  { %3517 = vmatprep.mubr.msk.f32.mxu1 %vm3775_vm1, %v3771_v4 }
0x134b   :  { %v2457_v51 = vpop.f32.mrb[36].mxu0 }
0x134c   :  { %v3471_v53 = vpop.f32.mrb[37].mxu0  ;;  %v2458_v13 = vadd.f32 %v4550_v21, %v2457_v51 }
0x134f   :  { %v2462_v54 = vpop.f32.mrb[38].mxu0 }
0x1350   :  { %v3474_v55 = vpop.f32.mrb[39].mxu0  ;;  %v2463_v14 = vadd.f32 %v4550_v21, %v2462_v54 }
0x1352   :  { %v2712_v57 = vpop.f32.mrb[48].mxu1 }
0x1353   :  { %v2467_v58 = vpop.f32.mrb[40].mxu0  ;;  %v2713_v59 = vadd.f32 %v2712_v57, %v2635_v56  ;;  %v3486_v60 = vpop.f32.mrb[49].mxu1 }
0x1354   :  { %v3477_v62 = vpop.f32.mrb[41].mxu0  ;;  %v2468_v16 = vadd.f32 %v4550_v21, %v2467_v58 }
0x1355   :  { %3496 = vmatmul.mubr.msk.f32.vlgmr.msra.gmra.mrb[42].mxu0 %vm249_vm2, %v2713_v59 }
0x1356   :  { %v2717_v11 = vpop.f32.mrb[50].mxu1  ;;  %3498 = vmatprep.mubr.msk.f32.mxu0 %vm3775_vm1, %v3771_v4  ;;  %3505 = vmatpush3.msra.mxu0 %v199_v61 }
0x1357   :  { %v2718_v1 = vadd.f32 %v2717_v11, %v2635_v56  ;;  %v3489_v2 = vpop.f32.mrb[51].mxu1 }
0x1359   :  { %3499 = vmatmul.mubr.msk.f32.gmra.mrb[44].mxu0 %vm249_vm2, %v2718_v1 }
0x135a   :  { %v2722_v3 = vpop.f32.mrb[52].mxu1  ;;  %3501 = vmatprep.mubr.msk.f32.mxu0 %vm3775_vm1, %v3771_v4 }
0x135b   :  { %v2723_v52 = vadd.f32 %v2722_v3, %v2635_v56  ;;  %v3492_v7 = vpop.f32.mrb[53].mxu1 }
0x135d   :  { %3502 = vmatmul.mubr.msk.f32.gmra.mrb[46].mxu0 %vm249_vm2, %v2723_v52 }
0x135e   :  { %3506 = vmatprep.mubr.msk.f32.mxu0 %vm3775_vm1, %v3771_v4 }
0x1361   :  { %3507 = vmatmul.mubr.msk.f32.vlgmr.msra.gmra.mrb[42].mxu0 %vm249_vm2, %v2458_v13 }
0x1362   :  { %3509 = vmatprep.mubr.msk.f32.mxu0 %vm3775_vm1, %v3771_v4 }
0x1365   :  { %3510 = vmatmul.mubr.msk.f32.gmra.mrb[44].mxu0 %vm249_vm2, %v2463_v14 }
0x1366   :  { %3512 = vmatprep.mubr.msk.f32.mxu0 %vm3775_vm1, %v3771_v4 }
0x1369   :  { %3513 = vmatmul.mubr.msk.f32.gmra.mrb[46].mxu0 %vm249_vm2, %v2468_v16 }
0x1434   :  { %v2890_v17 = vpop.f32.mrb[42].mxu0 }
0x1435   :  { %v3508_v18 = vpop.f32.mrb[43].mxu0  ;;  %3518 = vmatmul.mubr.msk.f32.vlgmr.msra.gmra.mrb[54].mxu1 %vm249_vm2, %v2890_v17 }
0x1436   :  { %3520 = vmatprep.mubr.msk.f32.mxu1 %vm3775_vm1, %v3771_v4 }
0x1438   :  { %v2895_v19 = vpop.f32.mrb[44].mxu0 }
0x1439   :  { %v3511_v23 = vpop.f32.mrb[45].mxu0  ;;  %3521 = vmatmul.mubr.msk.f32.gmra.mrb[56].mxu1 %vm249_vm2, %v2895_v19 }
0x143a   :  { %3523 = vmatprep.mubr.msk.f32.mxu1 %vm3775_vm1, %v3771_v4 }
0x143c   :  { %v2900_v25 = vpop.f32.mrb[46].mxu0 }
0x143d   :  { %v3514_v26 = vpop.f32.mrb[47].mxu0  ;;  %3524 = vmatmul.mubr.msk.f32.gmra.mrb[58].mxu1 %vm249_vm2, %v2900_v25 }
0x143e   :  { %3698 = shalt.err (!%p3695_p4)
}
0x143f   :  { %s3699_s23 = scalar_lea.hbm %s3964_s9, 384 }
0x1440   :  { %p3700_p5 = scmp.ne.s32.totalorder %s3964_s9, %s3699_s23  ;;  %p3703_p6 = scmp.lt.u32.totalorder %s3699_s23, %s3964_s9 }
0x1442   :  { %p3705_p7 = pnand %p3703_p6, %p3700_p5 }
0x1444   :  { %3708 = shalt.err (!%p3705_p7)
}
0x1445   :  { %s3779_s26 = smov 128   ;;  %v3153_v4 = vld [vmem:[%s3959_s13] ss:$0 sm:$0xff]  ;;  %s3780_s0 = smov [#allocation4]  }
0x1446   :  { %3025 = dma.vmem_to_hbm [thread:$0]  %s3020_s18, 384, %s3964_s9, [#allocation3], %s3779_s26, %s3779_s26, %s3773_s28  }
0x1447   :  { %s3031_s9 = sshll.u32 %s3780_s0, 4  ;;  %s3032_s9 = int_to_ptr.vmem [resolvable:$true] %s3031_s9 }
0x1448   :  { %s3709_s13 = scalar_lea.vmem %s3032_s9, 384  ;;  %p3714_p9 = scmp.lt.s32.totalorder %s3032_s9, %s3032_s9 }
0x1449   :  { %p3710_p8 = scmp.ne.s32.totalorder %s3032_s9, %s3709_s13  ;;  %p3715_p10 = scmp.lt.s32.totalorder %s3709_s13, %s3709_s13 }
0x144b   :  { %p3716_p11 = por %p3715_p10, %p3714_p9 }
0x144d   :  { %p3717_p12 = pnand %p3716_p11, %p3710_p8 }
0x1508   :  { %v2985_v27 = vpop.f32.mrb[54].mxu1 }
0x1509   :  { %v2986_v22 = vadd.f32 %v3153_v4, %v2985_v27  ;;  %v3519_v5 = vpop.f32.mrb[55].mxu1 }
0x150b   :  { %vm2999_vm1 = vcmp.ge.f32.partialorder %v2986_v22, 0.0  ;;  %v3002_v6 = vmul.f32 0.01, %v2986_v22 }
0x150c   :  { %v2990_v30 = vpop.f32.mrb[56].mxu1 }
0x150d   :  { %v3005_v8 = vsel %vm2999_vm1, %v2986_v22, %v3002_v6  ;;  %v2991_v32 = vadd.f32 %v3153_v4, %v2990_v30  ;;  %v3522_v33 = vpop.f32.mrb[57].mxu1 }
0x150e   :  { %3011 = vst.msk [vmem:[#allocation4] sm:$0xff] %vm249_vm2, %v3005_v8 }
0x150f   :  { %vm3000_vm5 = vcmp.ge.f32.partialorder %v2991_v32, 0.0  ;;  %v3003_v34 = vmul.f32 0.01, %v2991_v32 }
0x1510   :  { %v2995_v63 = vpop.f32.mrb[58].mxu1 }
0x1511   :  { %v3006_v15 = vsel %vm3000_vm5, %v2991_v32, %v3003_v34  ;;  %v2996_v21 = vadd.f32 %v3153_v4, %v2995_v63  ;;  %v3525_v0 = vpop.f32.mrb[59].mxu1 }
0x1512   :  { %3012 = vst.msk [vmem:[#allocation4 + $0x8] sm:$0xff] %vm249_vm2, %v3006_v15 }
0x1513   :  { %vm3001_vm13 = vcmp.ge.f32.partialorder %v2996_v21, 0.0  ;;  %v3004_v12 = vmul.f32 0.01, %v2996_v21 }
0x1515   :  { %v3007_v28 = vsel %vm3001_vm13, %v2996_v21, %v3004_v12 }
0x1516   :  { %3013 = vst.msk [vmem:[#allocation4 + $0x10] sm:$0xff] %vm249_vm2, %v3007_v28 }
0x1517   :  { %3720 = shalt.err (!%p3717_p12)
}
0x1518   :  { %s3721_s5 = scalar_lea.hbm %s3969_s27, 384 }
0x1519   :  { %p3722_p13 = scmp.ne.s32.totalorder %s3969_s27, %s3721_s5  ;;  %p3725_p0 = scmp.lt.u32.totalorder %s3721_s5, %s3969_s27 }
0x151b   :  { %p3727_p1 = pnand %p3725_p0, %p3722_p13 }
0x151d   :  { %3730 = shalt.err (!%p3727_p1)
}
0x151e   :  { %3037 = dma.vmem_to_hbm [thread:$0]  %s3032_s9, 384, %s3969_s27, [#allocation5], %s3779_s26, %s3779_s26, %s3773_s28  }
0x151f   :  { %3731 = dma.done.wait [#allocation3], 384  }
0x1520   :  { %3732 = vsyncadd [#allocation3], 4294966912 }
0x1521   :  { %3733 = dma.done.wait [#allocation5], 384  }
0x1522   :  { %3734 = vsyncadd [#allocation5], 4294966912 }
0x1523   :  { %3044 = vsyncpa [#allocation3], 1 }
0x1524   :  { %3045 = vsyncpa [#allocation5], 1 }

</bundles_post_ra>
